<compile_context>
chip_gen: v7x
topology: tpu7x:2x2x1
jax: 0.10.0
libtpu: 0.0.40
codegen_flags: <defaults>
</compile_context>

<pallas_src>
import jax
import jax.numpy as jnp
from jax.experimental import pallas as pl
from jax.experimental.pallas import tpu as pltpu

HIDDEN = 768            # BERT hidden size (pooler / fc1 input)
FC1_OUT = 256           # fc1 output size
NUM_CLS = 4             # number of fraud classes (num_cls in the reference)
NUM_CLS_PAD = 128       # fc2 output padded to a full lane width (lane-dense store)
MAX_TB = 256            # hard cap on the batch tile
EMB_TILE_BUDGET = 4 * 1024 * 1024   # bytes for one [TB,S,768] f32 slab (VMEM-safe x2-buffered)


def _round_up(x, m):
    return (x + m - 1) // m * m


def _pick_batch_tile(B, S):
    """Largest multiple-of-8 batch tile whose emb slab fits the VMEM budget."""
    budget = max(8, EMB_TILE_BUDGET // (S * HIDDEN * 4))
    tb = (budget // 8) * 8
    tb = min(tb, MAX_TB)
    tb = min(tb, _round_up(B, 8))
    return max(tb, 8)


# ----------------------------------------------------------------------------
# Pallas kernel: fused  mean-pool -> pooler(dense+tanh) -> fc1 -> ReLU -> fc2.
# ----------------------------------------------------------------------------
def _head_kernel(emb_ref, w_ref, pw_ref, pb_ref, w1_ref, b1_ref, w2_ref, b2_ref,
                 o_ref):
    # emb: [TB, S, 768] f32     w:  [TB, S, 1] f32 (mask / valid-token count)
    # pw:  [768, 768] bf16      pb: [1, 768] f32
    # w1:  [768, 256] bf16      b1: [1, 256] f32
    # w2:  [256, 128] bf16      b2: [1, 128] f32      o: [TB, 128] f32
    # Masked mean pool over the sequence axis (VPU multiply + XLU reduce).
    mean = jnp.sum(emb_ref[...] * w_ref[...], axis=1)               # [TB, 768] f32
    # BERT pooler: tanh(mean @ W_p + b_p)  (bf16 MXU, f32 accumulate, EUP tanh).
    pooled = jnp.tanh(
        jnp.dot(mean.astype(jnp.bfloat16), pw_ref[...],
                preferred_element_type=jnp.float32) + pb_ref[...])
    # dropout is identity in eval mode; fc1 + ReLU
    h = jnp.dot(pooled.astype(jnp.bfloat16), w1_ref[...],
                preferred_element_type=jnp.float32) + b1_ref[...]
    h = jnp.maximum(h, 0.0)
    # fc2 (padded to 128 lanes; extra columns are exactly zero)
    o = jnp.dot(h.astype(jnp.bfloat16), w2_ref[...],
                preferred_element_type=jnp.float32) + b2_ref[...]
    o_ref[...] = o.astype(o_ref.dtype)


def fused_pool_and_head(emb_f32, mask_w, kp):
    """emb_f32: [B,S,768] encoder output; mask_w: [B,S,1] -> padded logits [B,128]."""
    B, S, _ = emb_f32.shape
    TB = _pick_batch_tile(B, S)
    B_pad = _round_up(B, TB)
    if B_pad != B:
        emb_f32 = jnp.pad(emb_f32, ((0, B_pad - B), (0, 0), (0, 0)))
        mask_w = jnp.pad(mask_w, ((0, B_pad - B), (0, 0), (0, 0)))

    grid = (B_pad // TB,)

    flops = 2 * B_pad * (S * HIDDEN + HIDDEN * HIDDEN + HIDDEN * FC1_OUT
                         + FC1_OUT * NUM_CLS_PAD)
    bytes_accessed = int(
        emb_f32.size * 4 + mask_w.size * 4                            # activations
        + (kp["pw"].size + kp["w1"].size + kp["w2"].size) * 2         # bf16 weights
        + (kp["pb"].size + kp["b1"].size + kp["b2"].size) * 4         # f32 biases
        + B_pad * NUM_CLS_PAD * 4)                                    # f32 logits out
    cost = pl.CostEstimate(flops=flops,
                           transcendentals=B_pad * HIDDEN,
                           bytes_accessed=bytes_accessed)

    out = pl.pallas_call(
        _head_kernel,
        out_shape=jax.ShapeDtypeStruct((B_pad, NUM_CLS_PAD), jnp.float32),
        grid_spec=pltpu.PrefetchScalarGridSpec(
            num_scalar_prefetch=0,
            grid=grid,
            in_specs=[
                # activations: new block per grid step
                pl.BlockSpec((TB, S, HIDDEN), lambda i: (i, 0, 0)),
                pl.BlockSpec((TB, S, 1), lambda i: (i, 0, 0)),
                # weights / biases: same block every step -> stay VMEM-resident
                pl.BlockSpec((HIDDEN, HIDDEN), lambda i: (0, 0)),
                pl.BlockSpec((1, HIDDEN), lambda i: (0, 0)),
                pl.BlockSpec((HIDDEN, FC1_OUT), lambda i: (0, 0)),
                pl.BlockSpec((1, FC1_OUT), lambda i: (0, 0)),
                pl.BlockSpec((FC1_OUT, NUM_CLS_PAD), lambda i: (0, 0)),
                pl.BlockSpec((1, NUM_CLS_PAD), lambda i: (0, 0)),
            ],
            out_specs=pl.BlockSpec((TB, NUM_CLS_PAD), lambda i: (i, 0)),
        ),
        compiler_params=pltpu.CompilerParams(
            dimension_semantics=("parallel",)),      # megacore-shardable on v7x
        cost_estimate=cost,
    )(emb_f32, mask_w, kp["pw"], kp["pb"], kp["w1"], kp["b1"], kp["w2"], kp["b2"])
    return out[:B]


# ----------------------------------------------------------------------------
# Parameter init + one-time packing for the kernel (padding/casting hoisted
# out of the per-call forward path).
# ----------------------------------------------------------------------------
def init_params(key, vocab_size=64):
    ks = jax.random.split(key, 6)
    scale = 0.02
    return {
        # synthetic "bert" stand-in
        "emb": scale * jax.random.normal(ks[0], (vocab_size, HIDDEN), jnp.float32),
        "pooler_w": scale * jax.random.normal(ks[1], (HIDDEN, HIDDEN), jnp.float32),
        "pooler_b": jnp.zeros((HIDDEN,), jnp.float32),
        # classifier head (matches nn.Linear(768,256), nn.Linear(256,num_cls))
        "fc1_w": scale * jax.random.normal(ks[2], (HIDDEN, FC1_OUT), jnp.float32),
        "fc1_b": scale * jax.random.normal(ks[3], (FC1_OUT,), jnp.float32),
        "fc2_w": scale * jax.random.normal(ks[4], (FC1_OUT, NUM_CLS), jnp.float32),
        "fc2_b": scale * jax.random.normal(ks[5], (NUM_CLS,), jnp.float32),
    }


def pack_kernel_params(params):
    """One-time cast/pad of pooler + head weights for the Pallas kernel."""
    w2_pad = (jnp.zeros((FC1_OUT, NUM_CLS_PAD), jnp.float32)
              .at[:, :NUM_CLS].set(params["fc2_w"]))
    b2_pad = (jnp.zeros((1, NUM_CLS_PAD), jnp.float32)
              .at[0, :NUM_CLS].set(params["fc2_b"]))
    return {
        "pw": params["pooler_w"].astype(jnp.bfloat16),
        "pb": params["pooler_b"].reshape(1, HIDDEN),
        "w1": params["fc1_w"].astype(jnp.bfloat16),
        "b1": params["fc1_b"].reshape(1, FC1_OUT),
        "w2": w2_pad.astype(jnp.bfloat16),
        "b2": b2_pad,
    }


# ----------------------------------------------------------------------------
# Forward: embedding gather in XLA, everything else in the fused kernel.
# ----------------------------------------------------------------------------
def fraud_url_classifier_forward(params, kernel_params, input_ids, attention_mask):
    # TODO(synk): pretrained BERT transformer encoder body not re-implemented;
    # an embedding lookup (XLA gather) feeds the fused pool/pooler/head kernel.
    emb = params["emb"][input_ids]                                   # [B, S, 768] f32
    m = attention_mask.astype(jnp.float32)
    w = (m / jnp.maximum(jnp.sum(m, axis=1, keepdims=True), 1.0))[..., None]  # [B,S,1]
    logits_pad = fused_pool_and_head(emb, w, kernel_params)          # [B, 128]
    return logits_pad[:, :NUM_CLS]                                   # [B, num_cls]


# ----------------------------------------------------------------------------
def _reference_forward(params, input_ids, attention_mask):
    """Pure-JAX f32 reference of the same forward, for a sanity check."""
    emb = params["emb"][input_ids]
    m = attention_mask.astype(jnp.float32)[..., None]
    mean = jnp.sum(emb * m, axis=1) / jnp.maximum(jnp.sum(m, axis=1), 1.0)
    pooled = jnp.tanh(mean @ params["pooler_w"] + params["pooler_b"])
    h = jnp.maximum(pooled @ params["fc1_w"] + params["fc1_b"], 0.0)
    return h @ params["fc2_w"] + params["fc2_b"]


if __name__ == "__main__":
    key = jax.random.PRNGKey(0)
    pkey, ikey = jax.random.split(key)

    B, S, VOCAB = 2, 8, 64
    params = init_params(pkey, vocab_size=VOCAB)
    kernel_params = pack_kernel_params(params)   # padded/cast once, reused per call

    input_ids = jax.random.randint(ikey, (B, S), 0, VOCAB, dtype=jnp.int32)
    attention_mask = jnp.ones((B, S), jnp.int32).at[1, 6:].set(0)  # ragged mask

    logits = fraud_url_classifier_forward(params, kernel_params,
                                          input_ids, attention_mask)
    logits = jax.block_until_ready(logits)

    ref = _reference_forward(params, input_ids, attention_mask)
    assert logits.shape == (B, NUM_CLS)
    # bf16 MXU operands with f32 accumulation -> loosened tolerance vs f32 ref.
    assert jnp.allclose(logits, ref, atol=1e-2, rtol=1e-2), "mismatch vs reference"

    print("KERNEL_OK")
</pallas_src>

<mosaic_0001>
module attributes {stable_mosaic.version = 11 : i64} {
  func.func @_head_kernel(%arg0: i32, %arg1: memref<8x8x768xf32, #tpu.memory_space<vmem>>, %arg2: memref<8x8x1xf32, #tpu.memory_space<vmem>>, %arg3: memref<768x768xbf16, #tpu.memory_space<vmem>>, %arg4: memref<1x768xf32, #tpu.memory_space<vmem>>, %arg5: memref<768x256xbf16, #tpu.memory_space<vmem>>, %arg6: memref<1x256xf32, #tpu.memory_space<vmem>>, %arg7: memref<256x128xbf16, #tpu.memory_space<vmem>>, %arg8: memref<1x128xf32, #tpu.memory_space<vmem>>, %arg9: memref<8x128xf32, #tpu.memory_space<vmem>>) attributes {dimension_semantics = [#tpu.dimension_semantics<parallel>], iteration_bounds = array<i64: 1>, scalar_prefetch = 0 : i64, scratch_operands = 0 : i64, tpu.core_type = #tpu.core_type<tc>, window_params = [{transform_indices = @transform_0, window_bounds = array<i64: 8, 8, 768>}, {transform_indices = @transform_1, window_bounds = array<i64: 8, 8, 1>}, {pipeline_mode = #tpu.pipeline_mode<synchronous>, transform_indices = @transform_2, window_bounds = array<i64: 768, 768>}, {pipeline_mode = #tpu.pipeline_mode<synchronous>, transform_indices = @transform_3, window_bounds = array<i64: 1, 768>}, {pipeline_mode = #tpu.pipeline_mode<synchronous>, transform_indices = @transform_4, window_bounds = array<i64: 768, 256>}, {pipeline_mode = #tpu.pipeline_mode<synchronous>, transform_indices = @transform_5, window_bounds = array<i64: 1, 256>}, {pipeline_mode = #tpu.pipeline_mode<synchronous>, transform_indices = @transform_6, window_bounds = array<i64: 256, 128>}, {pipeline_mode = #tpu.pipeline_mode<synchronous>, transform_indices = @transform_7, window_bounds = array<i64: 1, 128>}, {transform_indices = @transform_8, window_bounds = array<i64: 8, 128>}]} {
    %c0 = arith.constant 0 : index
    %c0_0 = arith.constant 0 : index
    %c0_1 = arith.constant 0 : index
    %0 = vector.load %arg1[%c0, %c0_0, %c0_1] : memref<8x8x768xf32, #tpu.memory_space<vmem>>, vector<8x8x768xf32>
    %c0_2 = arith.constant 0 : index
    %c0_3 = arith.constant 0 : index
    %c0_4 = arith.constant 0 : index
    %1 = vector.load %arg2[%c0_2, %c0_3, %c0_4] : memref<8x8x1xf32, #tpu.memory_space<vmem>>, vector<8x8x1xf32>
    %2 = vector.broadcast %1 : vector<8x8x1xf32> to vector<8x8x768xf32>
    %3 = arith.mulf %0, %2 : vector<8x8x768xf32>
    %cst = arith.constant dense<0.000000e+00> : vector<8x768xf32>
    %4 = vector.multi_reduction <add>, %3, %cst [1] : vector<8x8x768xf32> to vector<8x768xf32>
    %5 = arith.truncf %4 : vector<8x768xf32> to vector<8x768xbf16>
    %c0_5 = arith.constant 0 : index
    %c0_6 = arith.constant 0 : index
    %6 = vector.load %arg3[%c0_5, %c0_6] : memref<768x768xbf16, #tpu.memory_space<vmem>>, vector<768x768xbf16>
    %cst_7 = arith.constant dense<0.000000e+00> : vector<8x768xf32>
    %7 = tpu.matmul %5, %6, %cst_7 {dimension_numbers = #tpu.dot_dimension_numbers<[1], [0], [0], [1], [0, 0, 1, 1], [], []>} : vector<8x768xbf16>, vector<768x768xbf16>, vector<8x768xf32> -> vector<8x768xf32>
    %c0_8 = arith.constant 0 : index
    %c0_9 = arith.constant 0 : index
    %8 = vector.load %arg4[%c0_8, %c0_9] : memref<1x768xf32, #tpu.memory_space<vmem>>, vector<1x768xf32>
    %9 = vector.broadcast %8 : vector<1x768xf32> to vector<8x768xf32>
    %10 = arith.addf %7, %9 : vector<8x768xf32>
    %11 = math.tanh %10 : vector<8x768xf32>
    %12 = arith.truncf %11 : vector<8x768xf32> to vector<8x768xbf16>
    %c0_10 = arith.constant 0 : index
    %c0_11 = arith.constant 0 : index
    %13 = vector.load %arg5[%c0_10, %c0_11] : memref<768x256xbf16, #tpu.memory_space<vmem>>, vector<768x256xbf16>
    %cst_12 = arith.constant dense<0.000000e+00> : vector<8x256xf32>
    %14 = tpu.matmul %12, %13, %cst_12 {dimension_numbers = #tpu.dot_dimension_numbers<[1], [0], [0], [1], [0, 0, 1, 1], [], []>} : vector<8x768xbf16>, vector<768x256xbf16>, vector<8x256xf32> -> vector<8x256xf32>
    %c0_13 = arith.constant 0 : index
    %c0_14 = arith.constant 0 : index
    %15 = vector.load %arg6[%c0_13, %c0_14] : memref<1x256xf32, #tpu.memory_space<vmem>>, vector<1x256xf32>
    %16 = vector.broadcast %15 : vector<1x256xf32> to vector<8x256xf32>
    %17 = arith.addf %14, %16 : vector<8x256xf32>
    %cst_15 = arith.constant 0.000000e+00 : f32
    %18 = vector.broadcast %cst_15 : f32 to vector<8x256xf32>
    %19 = arith.maximumf %17, %18 : vector<8x256xf32>
    %20 = arith.truncf %19 : vector<8x256xf32> to vector<8x256xbf16>
    %c0_16 = arith.constant 0 : index
    %c0_17 = arith.constant 0 : index
    %21 = vector.load %arg7[%c0_16, %c0_17] : memref<256x128xbf16, #tpu.memory_space<vmem>>, vector<256x128xbf16>
    %cst_18 = arith.constant dense<0.000000e+00> : vector<8x128xf32>
    %22 = tpu.matmul %20, %21, %cst_18 {dimension_numbers = #tpu.dot_dimension_numbers<[1], [0], [0], [1], [0, 0, 1, 1], [], []>} : vector<8x256xbf16>, vector<256x128xbf16>, vector<8x128xf32> -> vector<8x128xf32>
    %c0_19 = arith.constant 0 : index
    %c0_20 = arith.constant 0 : index
    %23 = vector.load %arg8[%c0_19, %c0_20] : memref<1x128xf32, #tpu.memory_space<vmem>>, vector<1x128xf32>
    %24 = vector.broadcast %23 : vector<1x128xf32> to vector<8x128xf32>
    %25 = arith.addf %22, %24 : vector<8x128xf32>
    %c0_21 = arith.constant 0 : index
    %c0_22 = arith.constant 0 : index
    %26 = vector.load %arg9[%c0_21, %c0_22] : memref<8x128xf32, #tpu.memory_space<vmem>>, vector<8x128xf32>
    tpu.vector_store %arg9[%c0_21, %c0_22], %25 {strides = array<i32>} : memref<8x128xf32, #tpu.memory_space<vmem>>, vector<8x128xf32>,
    return
  }
  func.func @transform_0(%arg0: i32) -> (i32, i32, i32) {
    %c0_i32 = arith.constant 0 : i32
    %c0_i32_0 = arith.constant 0 : i32
    %c0_i32_1 = arith.constant 0 : i32
    return %arg0, %c0_i32, %c0_i32_0 : i32, i32, i32
  }
  func.func @transform_1(%arg0: i32) -> (i32, i32, i32) {
    %c0_i32 = arith.constant 0 : i32
    %c0_i32_0 = arith.constant 0 : i32
    %c0_i32_1 = arith.constant 0 : i32
    return %arg0, %c0_i32, %c0_i32_0 : i32, i32, i32
  }
  func.func @transform_2(%arg0: i32) -> (i32, i32) {
    %c0_i32 = arith.constant 0 : i32
    %c0_i32_0 = arith.constant 0 : i32
    %c0_i32_1 = arith.constant 0 : i32
    return %c0_i32, %c0_i32_0 : i32, i32
  }
  func.func @transform_3(%arg0: i32) -> (i32, i32) {
    %c0_i32 = arith.constant 0 : i32
    %c0_i32_0 = arith.constant 0 : i32
    %c0_i32_1 = arith.constant 0 : i32
    return %c0_i32, %c0_i32_0 : i32, i32
  }
  func.func @transform_4(%arg0: i32) -> (i32, i32) {
    %c0_i32 = arith.constant 0 : i32
    %c0_i32_0 = arith.constant 0 : i32
    %c0_i32_1 = arith.constant 0 : i32
    return %c0_i32, %c0_i32_0 : i32, i32
  }
  func.func @transform_5(%arg0: i32) -> (i32, i32) {
    %c0_i32 = arith.constant 0 : i32
    %c0_i32_0 = arith.constant 0 : i32
    %c0_i32_1 = arith.constant 0 : i32
    return %c0_i32, %c0_i32_0 : i32, i32
  }
  func.func @transform_6(%arg0: i32) -> (i32, i32) {
    %c0_i32 = arith.constant 0 : i32
    %c0_i32_0 = arith.constant 0 : i32
    %c0_i32_1 = arith.constant 0 : i32
    return %c0_i32, %c0_i32_0 : i32, i32
  }
  func.func @transform_7(%arg0: i32) -> (i32, i32) {
    %c0_i32 = arith.constant 0 : i32
    %c0_i32_0 = arith.constant 0 : i32
    %c0_i32_1 = arith.constant 0 : i32
    return %c0_i32, %c0_i32_0 : i32, i32
  }
  func.func @transform_8(%arg0: i32) -> (i32, i32) {
    %c0_i32 = arith.constant 0 : i32
    %c0_i32_0 = arith.constant 0 : i32
    return %arg0, %c0_i32 : i32, i32
  }
}

</mosaic_0001>

<bundles_post_ra>
// kernel: tpu_custom_call.1
= control target key start
LH: loop header
LB: loop body
LE: loop exit
PB: predicated region body
PF: predicated region fallthrough
CT: control target
= control target key end

     0   :  { %13 = vsyncpa [#allocation3], 0  ;;  %s5583_s0 = inlined_call_operand.hbm [shape: f32[8,8,768], index: 0, kind: input, shape index: {}]   ;;  %s5584_s1 = inlined_call_operand.vmem [shape: f32[8,8,1], index: 1, kind: input, shape index: {}]   ;;  %s5585_s2 = inlined_call_operand.hbm [shape: bf16[768,768], index: 2, kind: input, shape index: {}]   ;;  %s5586_s3 = inlined_call_operand.hbm [shape: f32[1,768], index: 3, kind: input, shape index: {}]   ;;  %s5587_s4 = inlined_call_operand.hbm [shape: bf16[768,256], index: 4, kind: input, shape index: {}]   ;;  %s5588_s5 = inlined_call_operand.hbm [shape: f32[1,256], index: 5, kind: input, shape index: {}]   ;;  %s5589_s6 = inlined_call_operand.hbm [shape: bf16[256,128], index: 6, kind: input, shape index: {}]   ;;  %s5590_s7 = inlined_call_operand.hbm [shape: f32[1,128], index: 7, kind: input, shape index: {}]   ;;  %s5591_s8 = inlined_call_operand.hbm [shape: f32[8,128], index: 8, kind: output, shape index: {}]  }
   0x1   :  { %14 = vsyncpa [#allocation6], 0 }
   0x2   :  { %15 = vsyncpa [#allocation9], 0 }
   0x3   :  { %16 = vsyncpa [#allocation12], 0 }
   0x4   :  { %17 = vsyncpa [#allocation4], 0  ;;  %s5079_s27 = smov [#allocation5]   ;;  %s4893_s9 = scalar_lea.hbm %s5585_s2, 36864 }
   0x5   :  { %s37_s28 = sshll.u32 %s5079_s27, 4  ;;  %p4894_p0 = scmp.ne.s32.totalorder %s5585_s2, %s4893_s9  ;;  %s38_s28 = int_to_ptr.vmem [resolvable:$true] %s37_s28 }
   0x6   :  { %p4897_p1 = scmp.lt.u32.totalorder %s4893_s9, %s5585_s2 }
   0x8   :  { %p4899_p2 = pnand %p4897_p1, %p4894_p0 }
   0xa   :  { %4902 = shalt.err (!%p4899_p2)
}
   0xb   :  { %s4903_s14 = scalar_lea.vmem %s38_s28, 36864  ;;  %p4908_p4 = scmp.lt.s32.totalorder %s38_s28, %s38_s28 }
   0xc   :  { %p4904_p3 = scmp.ne.s32.totalorder %s38_s28, %s4903_s14  ;;  %p4909_p5 = scmp.lt.s32.totalorder %s4903_s14, %s4903_s14 }
   0xe   :  { %p4910_p6 = por %p4909_p5, %p4908_p4 }
  0x10   :  { %p4911_p7 = pnand %p4910_p6, %p4904_p3 }
  0x12   :  { %4914 = shalt.err (!%p4911_p7)
}
  0x13   :  { %s5080_s15 = smov 384   ;;  %s5081_s16 = smov 24  }
  0x14   :  { %43 = dma.hbm_to_vmem [thread:$0]  %s5585_s2, 36864, %s38_s28, [#allocation6], %s5080_s15, %s5080_s15, %s5081_s16  }
  0x15   :  { %s5082_s19 = smov [#allocation8]   ;;  %s4915_s23 = scalar_lea.hbm %s5587_s4, 12288 }
  0x16   :  { %s59_s20 = sshll.u32 %s5082_s19, 4  ;;  %p4916_p8 = scmp.ne.s32.totalorder %s5587_s4, %s4915_s23  ;;  %s60_s20 = int_to_ptr.vmem [resolvable:$true] %s59_s20 }
  0x17   :  { %p4919_p9 = scmp.lt.u32.totalorder %s4915_s23, %s5587_s4 }
  0x19   :  { %p4921_p10 = pnand %p4919_p9, %p4916_p8 }
  0x1b   :  { %4924 = shalt.err (!%p4921_p10)
}
  0x1c   :  { %s4925_s29 = scalar_lea.vmem %s60_s20, 12288  ;;  %p4930_p12 = scmp.lt.s32.totalorder %s60_s20, %s60_s20 }
  0x1d   :  { %p4926_p11 = scmp.ne.s32.totalorder %s60_s20, %s4925_s29  ;;  %p4931_p13 = scmp.lt.s32.totalorder %s4925_s29, %s4925_s29 }
  0x1f   :  { %p4932_p0 = por %p4931_p13, %p4930_p12 }
  0x21   :  { %p4933_p1 = pnand %p4932_p0, %p4926_p11 }
  0x23   :  { %4936 = shalt.err (!%p4933_p1)
}
  0x24   :  { %s5083_s2 = smov 128   ;;  %s5084_s28 = smov 8  }
  0x25   :  { %65 = dma.hbm_to_vmem [thread:$0]  %s5587_s4, 12288, %s60_s20, [#allocation9], %s5083_s2, %s5083_s2, %s5084_s28  }
  0x26   :  { %s5085_s10 = smov [#allocation11]   ;;  %s4937_s14 = scalar_lea.hbm %s5589_s6, 2048 }
  0x27   :  { %s81_s11 = sshll.u32 %s5085_s10, 4  ;;  %p4938_p2 = scmp.ne.s32.totalorder %s5589_s6, %s4937_s14  ;;  %s82_s11 = int_to_ptr.vmem [resolvable:$true] %s81_s11 }
  0x28   :  { %p4941_p3 = scmp.lt.u32.totalorder %s4937_s14, %s5589_s6 }
  0x2a   :  { %p4943_p4 = pnand %p4941_p3, %p4938_p2 }
  0x2c   :  { %4946 = shalt.err (!%p4943_p4)
}
  0x2d   :  { %s4947_s19 = scalar_lea.vmem %s82_s11, 2048  ;;  %p4952_p6 = scmp.lt.s32.totalorder %s82_s11, %s82_s11 }
  0x2e   :  { %p4948_p5 = scmp.ne.s32.totalorder %s82_s11, %s4947_s19  ;;  %p4953_p7 = scmp.lt.s32.totalorder %s4947_s19, %s4947_s19 }
  0x30   :  { %p4954_p8 = por %p4953_p7, %p4952_p6 }
  0x32   :  { %p4955_p9 = pnand %p4954_p8, %p4948_p5 }
  0x34   :  { %4958 = shalt.err (!%p4955_p9)
}
  0x35   :  { %s5086_s4 = smov 64   ;;  %s5087_s20 = smov 4  }
  0x36   :  { %87 = dma.hbm_to_vmem [thread:$0]  %s5589_s6, 2048, %s82_s11, [#allocation12], %s5086_s4, %s5086_s4, %s5087_s20  }
  0x37   :  { %s5088_s23 = smov [#allocation2]   ;;  %s4959_s27 = scalar_lea.hbm %s5583_s0, 6144 }
  0x38   :  { %s23_s24 = sshll.u32 %s5088_s23, 4  ;;  %p4960_p10 = scmp.ne.s32.totalorder %s5583_s0, %s4959_s27  ;;  %s24_s24 = int_to_ptr.vmem [resolvable:$true] %s23_s24 }
  0x39   :  { %p4963_p11 = scmp.lt.u32.totalorder %s4959_s27, %s5583_s0 }
  0x3b   :  { %p4965_p12 = pnand %p4963_p11, %p4960_p10 }
  0x3d   :  { %4968 = shalt.err (!%p4965_p12)
}
  0x3e   :  { %s4969_s9 = scalar_lea.vmem %s24_s24, 6144  ;;  %p4974_p0 = scmp.lt.s32.totalorder %s24_s24, %s24_s24 }
  0x3f   :  { %p4970_p13 = scmp.ne.s32.totalorder %s24_s24, %s4969_s9  ;;  %p4975_p1 = scmp.lt.s32.totalorder %s4969_s9, %s4969_s9 }
  0x41   :  { %p4976_p2 = por %p4975_p1, %p4974_p0 }
  0x43   :  { %p4977_p3 = pnand %p4976_p2, %p4970_p13 }
  0x45   :  { %4980 = shalt.err (!%p4977_p3)
}
  0x46   :  { %s5089_s6 = smov 768   ;;  %s5090_s10 = smov 48  }
  0x47   :  { %29 = dma.hbm_to_vmem [thread:$0]  %s5583_s0, 6144, %s24_s24, [#allocation3], %s5089_s6, %s5089_s6, %s5090_s10  }
  0x48   :  { %s5091_s13 = smov [#allocation7]   ;;  %s5092_s15 = smov [#allocation10]  }
  0x49   :  { %s50_s14 = sshll.u32 %s5091_s13, 4  ;;  %s72_s16 = sshll.u32 %s5092_s15, 4  ;;  %s51_s14 = int_to_ptr.vmem [resolvable:$true] %s50_s14  ;;  %s73_s16 = int_to_ptr.vmem [resolvable:$true] %s72_s16 }
  0x4a   :  { %s4981_s19 = scalar_lea.hbm %s5586_s3, 96 }
  0x4b   :  { %p4982_p4 = scmp.ne.s32.totalorder %s5586_s3, %s4981_s19  ;;  %p4985_p5 = scmp.lt.u32.totalorder %s4981_s19, %s5586_s3 }
  0x4d   :  { %p4987_p6 = pnand %p4985_p5, %p4982_p4 }
  0x4f   :  { %4990 = shalt.err (!%p4987_p6)
}
  0x50   :  { %s4991_s0 = scalar_lea.vmem %s51_s14, 96  ;;  %p4996_p8 = scmp.lt.s32.totalorder %s51_s14, %s51_s14 }
  0x51   :  { %p4992_p7 = scmp.ne.s32.totalorder %s51_s14, %s4991_s0  ;;  %p4997_p9 = scmp.lt.s32.totalorder %s4991_s0, %s4991_s0 }
  0x53   :  { %p4998_p10 = por %p4997_p9, %p4996_p8 }
  0x55   :  { %p4999_p11 = pnand %p4998_p10, %p4992_p7 }
  0x57   :  { %5002 = shalt.err (!%p4999_p11)
}
  0x58   :  { %53 = dma.hbm_to_vmem [thread:$0]  %s5586_s3, 96, %s51_s14, [#allocation6]  }
  0x59   :  { %s5003_s27 = scalar_lea.hbm %s5588_s5, 32 }
  0x5a   :  { %p5004_p12 = scmp.ne.s32.totalorder %s5588_s5, %s5003_s27  ;;  %p5007_p13 = scmp.lt.u32.totalorder %s5003_s27, %s5588_s5 }
  0x5c   :  { %p5009_p0 = pnand %p5007_p13, %p5004_p12 }
  0x5e   :  { %5012 = shalt.err (!%p5009_p0)
}
  0x5f   :  { %s5013_s9 = scalar_lea.vmem %s73_s16, 32  ;;  %p5018_p2 = scmp.lt.s32.totalorder %s73_s16, %s73_s16 }
  0x60   :  { %p5014_p1 = scmp.ne.s32.totalorder %s73_s16, %s5013_s9  ;;  %p5019_p3 = scmp.lt.s32.totalorder %s5013_s9, %s5013_s9 }
  0x62   :  { %p5020_p4 = por %p5019_p3, %p5018_p2 }
  0x64   :  { %p5021_p5 = pnand %p5020_p4, %p5014_p1 }
  0x66   :  { %5024 = shalt.err (!%p5021_p5)
}
  0x67   :  { %75 = dma.hbm_to_vmem [thread:$0]  %s5588_s5, 32, %s73_s16, [#allocation9]  }
  0x68   :  { %s5093_s10 = smov [#allocation13]   ;;  %s5025_s14 = scalar_lea.hbm %s5590_s7, 16 }
  0x69   :  { %s94_s11 = sshll.u32 %s5093_s10, 4  ;;  %p5026_p6 = scmp.ne.s32.totalorder %s5590_s7, %s5025_s14  ;;  %s95_s11 = int_to_ptr.vmem [resolvable:$true] %s94_s11 }
  0x6a   :  { %p5029_p7 = scmp.lt.u32.totalorder %s5025_s14, %s5590_s7 }
  0x6c   :  { %p5031_p8 = pnand %p5029_p7, %p5026_p6 }
  0x6e   :  { %5034 = shalt.err (!%p5031_p8)
}
  0x6f   :  { %s5035_s4 = scalar_lea.vmem %s95_s11, 16  ;;  %s5039_s5 = scalar_lea.vmem %s95_s11, 32 }
  0x70   :  { %p5036_p9 = scmp.ne.s32.totalorder %s95_s11, %s5035_s4  ;;  %p5040_p10 = scmp.lt.s32.totalorder %s95_s11, %s95_s11 }
  0x71   :  { %p5041_p11 = scmp.lt.s32.totalorder %s5039_s5, %s5035_s4 }
  0x73   :  { %p5042_p12 = por %p5041_p11, %p5040_p10 }
  0x75   :  { %p5043_p13 = pnand %p5042_p12, %p5036_p9 }
  0x77   :  { %5046 = shalt.err (!%p5043_p13)
}
  0x78   :  { %97 = dma.hbm_to_vmem [thread:$0]  %s5590_s7, 16, %s95_s11, [#allocation12]  }
  0x79   :  { %5069 = dma.done.wait [#allocation3], 6144  }
  0x7a   :  { %5070 = vsyncadd [#allocation3], 4294961152 }
  0x7b   :  { %5071 = dma.done.wait [#allocation6], 36960  }
  0x7c   :  { %5072 = vsyncadd [#allocation6], 4294930336 }
  0x7d   :  { %5073 = dma.done.wait [#allocation9], 12320  }
  0x7e   :  { %5074 = vsyncadd [#allocation9], 4294954976 }
  0x7f   :  { %5075 = dma.done.wait [#allocation12], 2064  }
  0x80   :  { %5076 = vsyncadd [#allocation12], 4294965232  ;;  %v5094_v0 = vmov 0   ;;  %v170_v1 = vld [vmem:[%s5584_s1 + $0x10] sm:$0xff]  ;;  %v168_v2 = vld [vmem:[%s5584_s1] sm:$0xff]  ;;  %vm1016_vm0 = vcmask 1041409  }
  0x81   :  { %4288 = vset.pattern.permute.xlu1 %v5094_v0  ;;  %4287 = vset.pattern.permute.xlu0 %v5094_v0  ;;  %v171_v3 = vld [vmem:[%s5584_s1 + $0x18] sm:$0xff]  ;;  %v169_v4 = vld [vmem:[%s5584_s1 + $0x8] sm:$0xff]  ;;  %v172_v7 = vld [vmem:[%s5584_s1 + $0x20] sm:$0xff]  ;;  %vm1018_vm1 = vcmask 1042434   ;;  %vm1020_vm2 = vcmask 1043459   ;;  %vm1022_vm3 = vcmask 1044484  }
  0x82   :  { %188 = vperm.xlu1 %4288, %v170_v1   ;;  %178 = vperm.xlu0 %4287, %v168_v2   ;;  %v4289_v5 = vld [vmem:[#allocation5 + $0x4] ss:$24 sps:$4 sm:$0xff]   ;;  %v173_v6 = vld [vmem:[%s5584_s1 + $0x28] sm:$0xff]  ;;  %v4293_v9 = vld [vmem:[#allocation5] ss:$24 sps:$4 sm:$0xff]   ;;  %vm1024_vm4 = vcmask 1045509  }
  0x83   :  { %v4291_v8 = vld [vmem:[#allocation5 + $0xc] ss:$24 sps:$4 sm:$0xff]   ;;  %v4294_v10 = vld [vmem:[#allocation5 + $0x8] ss:$24 sps:$4 sm:$0xff]   ;;  %2517 = vmatprep.subr.bf16.mxu0 %v4289_v5  ;;  %v4297_v12 = vld [vmem:[#allocation5 + $0x3c] ss:$24 sps:$4 sm:$0xff]  }
  0x84   :  { %2640 = vmatprep.subr.bf16.mxu1 %v4291_v8  ;;  %v4295_v11 = vld [vmem:[#allocation5 + $0x34] ss:$24 sps:$4 sm:$0xff]   ;;  %2518 = vmatpush1.bf16.msra.mxu0 %v4293_v9  ;;  %v4299_v13 = vld [vmem:[#allocation5 + $0x30] ss:$24 sps:$4 sm:$0xff]   ;;  %v175_v15 = vld [vmem:[%s5584_s1 + $0x38] sm:$0xff]  ;;  %vm1026_vm5 = vcmask 1046534  }
  0x85   :  { %2641 = vmatpush1.bf16.msra.mxu1 %v4294_v10  ;;  %v4300_v14 = vld [vmem:[#allocation5 + $0x38] ss:$24 sps:$4 sm:$0xff]   ;;  %2519 = vmatprep.subr.bf16.mxu0 %v4295_v11  ;;  %v4301_v16 = vld [vmem:[#allocation5 + $0x64] ss:$24 sps:$4 sm:$0xff]   ;;  %v4306_v20 = vld [vmem:[#allocation5 + $0x68] ss:$24 sps:$4 sm:$0xff]  }
  0x86   :  { %193 = vperm.xlu1 %4288, %v171_v3   ;;  %183 = vperm.xlu0 %4287, %v169_v4   ;;  %v4303_v17 = vld [vmem:[#allocation5 + $0x6c] ss:$24 sps:$4 sm:$0xff]   ;;  %v174_v18 = vld [vmem:[%s5584_s1 + $0x30] sm:$0xff]  ;;  %v4305_v19 = vld [vmem:[#allocation5 + $0x60] ss:$24 sps:$4 sm:$0xff]   ;;  %vm1028_vm6 = vcmask 1047559  }
  0x87   :  { %2642 = vmatprep.subr.bf16.mxu1 %v4297_v12  ;;  %v4307_v21 = vld [vmem:[#allocation5 + $0x94] ss:$24 sps:$4 sm:$0xff]   ;;  %v4311_v23 = vld [vmem:[#allocation5 + $0x90] ss:$24 sps:$4 sm:$0xff]   ;;  %v4313_v25 = vld [vmem:[#allocation5 + $0xc4] ss:$24 sps:$4 sm:$0xff]  }
  0x88   :  { %2520 = vmatpush1.bf16.msra.mxu0 %v4299_v13  ;;  %v4309_v22 = vld [vmem:[#allocation5 + $0x9c] ss:$24 sps:$4 sm:$0xff]   ;;  %v4312_v24 = vld [vmem:[#allocation5 + $0x98] ss:$24 sps:$4 sm:$0xff]   ;;  %v4315_v26 = vld [vmem:[#allocation5 + $0xcc] ss:$24 sps:$4 sm:$0xff]  }
  0x89   :  { %2643 = vmatpush1.bf16.msra.mxu1 %v4300_v14  ;;  %2521 = vmatprep.subr.bf16.mxu0 %v4301_v16  ;;  %v4317_v27 = vld [vmem:[#allocation5 + $0xc0] ss:$24 sps:$4 sm:$0xff]   ;;  %v4319_v29 = vld [vmem:[#allocation5 + $0xf4] ss:$24 sps:$4 sm:$0xff]   ;;  %v4323_v31 = vld [vmem:[#allocation5 + $0xf0] ss:$24 sps:$4 sm:$0xff]  }
  0x8a   :  { %203 = vperm.xlu1 %4288, %v173_v6   ;;  %198 = vperm.xlu0 %4287, %v172_v7   ;;  %v4318_v28 = vld [vmem:[#allocation5 + $0xc8] ss:$24 sps:$4 sm:$0xff]   ;;  %v4321_v30 = vld [vmem:[#allocation5 + $0xfc] ss:$24 sps:$4 sm:$0xff]   ;;  %v4324_v32 = vld [vmem:[#allocation5 + $0xf8] ss:$24 sps:$4 sm:$0xff]  }
  0x8b   :  { %2644 = vmatprep.subr.bf16.mxu1 %v4303_v17  ;;  %v4325_v33 = vld [vmem:[#allocation5 + $0x124] ss:$24 sps:$4 sm:$0xff]   ;;  %v4329_v35 = vld [vmem:[#allocation5 + $0x120] ss:$24 sps:$4 sm:$0xff]   ;;  %v4331_v37 = vld [vmem:[#allocation5 + $0x154] ss:$24 sps:$4 sm:$0xff]  }
  0x8c   :  { %2522 = vmatpush1.bf16.msra.mxu0 %v4305_v19  ;;  %v4327_v34 = vld [vmem:[#allocation5 + $0x12c] ss:$24 sps:$4 sm:$0xff]   ;;  %v4330_v36 = vld [vmem:[#allocation5 + $0x128] ss:$24 sps:$4 sm:$0xff]   ;;  %v4333_v38 = vld [vmem:[#allocation5 + $0x15c] ss:$24 sps:$4 sm:$0xff]  }
  0x8d   :  { %2645 = vmatpush1.bf16.msra.mxu1 %v4306_v20  ;;  %2523 = vmatprep.subr.bf16.mxu0 %v4307_v21  ;;  %v4335_v39 = vld [vmem:[#allocation5 + $0x150] ss:$24 sps:$4 sm:$0xff]   ;;  %v4337_v41 = vld [vmem:[#allocation5 + $0x184] ss:$24 sps:$4 sm:$0xff]   ;;  %v4341_v43 = vld [vmem:[#allocation5 + $0x180] ss:$24 sps:$4 sm:$0xff]  }
  0x8e   :  { %213 = vperm.xlu1 %4288, %v175_v15   ;;  %208 = vperm.xlu0 %4287, %v174_v18   ;;  %v4336_v40 = vld [vmem:[#allocation5 + $0x158] ss:$24 sps:$4 sm:$0xff]   ;;  %v4339_v42 = vld [vmem:[#allocation5 + $0x18c] ss:$24 sps:$4 sm:$0xff]   ;;  %v4342_v44 = vld [vmem:[#allocation5 + $0x188] ss:$24 sps:$4 sm:$0xff]  }
  0x8f   :  { %2646 = vmatprep.subr.bf16.mxu1 %v4309_v22  ;;  %v4343_v45 = vld [vmem:[#allocation5 + $0x1b4] ss:$24 sps:$4 sm:$0xff]   ;;  %v4347_v47 = vld [vmem:[#allocation5 + $0x1b0] ss:$24 sps:$4 sm:$0xff]   ;;  %v4349_v49 = vld [vmem:[#allocation5 + $0x1e4] ss:$24 sps:$4 sm:$0xff]  }
  0x90   :  { %2524 = vmatpush1.bf16.msra.mxu0 %v4311_v23  ;;  %v4345_v46 = vld [vmem:[#allocation5 + $0x1bc] ss:$24 sps:$4 sm:$0xff]   ;;  %v4348_v48 = vld [vmem:[#allocation5 + $0x1b8] ss:$24 sps:$4 sm:$0xff]   ;;  %v4351_v50 = vld [vmem:[#allocation5 + $0x1ec] ss:$24 sps:$4 sm:$0xff]  }
  0x91   :  { %2647 = vmatpush1.bf16.msra.mxu1 %v4312_v24  ;;  %2525 = vmatprep.subr.bf16.mxu0 %v4313_v25  ;;  %v4353_v51 = vld [vmem:[#allocation5 + $0x1e0] ss:$24 sps:$4 sm:$0xff]   ;;  %v4355_v53 = vld [vmem:[#allocation5 + $0x214] ss:$24 sps:$4 sm:$0xff]   ;;  %v4359_v55 = vld [vmem:[#allocation5 + $0x210] ss:$24 sps:$4 sm:$0xff]  }
  0x92   :  { %2648 = vmatprep.subr.bf16.mxu1 %v4315_v26  ;;  %v4354_v52 = vld [vmem:[#allocation5 + $0x1e8] ss:$24 sps:$4 sm:$0xff]   ;;  %v4357_v54 = vld [vmem:[#allocation5 + $0x21c] ss:$24 sps:$4 sm:$0xff]   ;;  %v4360_v56 = vld [vmem:[#allocation5 + $0x218] ss:$24 sps:$4 sm:$0xff]  }
  0x93   :  { %v4361_v57 = vld [vmem:[#allocation5 + $0x244] ss:$24 sps:$4 sm:$0xff]   ;;  %v4365_v59 = vld [vmem:[#allocation5 + $0x240] ss:$24 sps:$4 sm:$0xff]   ;;  %v4367_v61 = vld [vmem:[#allocation5 + $0x274] ss:$24 sps:$4 sm:$0xff]  }
  0x94   :  { %2526 = vmatpush1.bf16.msra.mxu0 %v4317_v27  ;;  %v4363_v58 = vld [vmem:[#allocation5 + $0x24c] ss:$24 sps:$4 sm:$0xff]   ;;  %v4366_v60 = vld [vmem:[#allocation5 + $0x248] ss:$24 sps:$4 sm:$0xff]   ;;  %v4369_v62 = vld [vmem:[#allocation5 + $0x27c] ss:$24 sps:$4 sm:$0xff]  }
  0x95   :  { %2649 = vmatpush1.bf16.msra.mxu1 %v4318_v28  ;;  %2527 = vmatprep.subr.bf16.mxu0 %v4319_v29  ;;  %v4371_v63 = vld [vmem:[#allocation5 + $0x270] ss:$24 sps:$4 sm:$0xff]   ;;  %v4373_v1 = vld [vmem:[#allocation5 + $0x2a4] ss:$24 sps:$4 sm:$0xff]   ;;  %v4377_v3 = vld [vmem:[#allocation5 + $0x2a0] ss:$24 sps:$4 sm:$0xff]  }
  0x96   :  { %2650 = vmatprep.subr.bf16.mxu1 %v4321_v30  ;;  %v4372_v0 = vld [vmem:[#allocation5 + $0x278] ss:$24 sps:$4 sm:$0xff]   ;;  %v4375_v2 = vld [vmem:[#allocation5 + $0x2ac] ss:$24 sps:$4 sm:$0xff]   ;;  %v4378_v4 = vld [vmem:[#allocation5 + $0x2a8] ss:$24 sps:$4 sm:$0xff]  }
  0x97   :  { %v4379_v5 = vld [vmem:[#allocation5 + $0x2d4] ss:$24 sps:$4 sm:$0xff]   ;;  %v4383_v7 = vld [vmem:[#allocation5 + $0x2d0] ss:$24 sps:$4 sm:$0xff]   ;;  %v4387_v9 = vld [vmem:[#allocation5 + $0x304] ss:$24 sps:$4 sm:$0xff]  }
  0x98   :  { %2528 = vmatpush1.bf16.msra.mxu0 %v4323_v31  ;;  %v4381_v6 = vld [vmem:[#allocation5 + $0x2dc] ss:$24 sps:$4 sm:$0xff]   ;;  %v4384_v8 = vld [vmem:[#allocation5 + $0x2d8] ss:$24 sps:$4 sm:$0xff]   ;;  %v4390_v10 = vld [vmem:[#allocation5 + $0x30c] ss:$24 sps:$4 sm:$0xff]  }
  0x99   :  { %2651 = vmatpush1.bf16.msra.mxu1 %v4324_v32  ;;  %2529 = vmatprep.subr.bf16.mxu0 %v4325_v33  ;;  %v132_v11 = vld [vmem:[#allocation2 + $0x60] sm:$0xff]  ;;  %v133_v12 = vld [vmem:[#allocation2 + $0x68] sm:$0xff]  ;;  %v134_v13 = vld [vmem:[#allocation2 + $0x70] sm:$0xff]  ;;  %s5095_s1 = smov [#allocation14]  }
  0x9a   :  { %2652 = vmatprep.subr.bf16.mxu1 %v4327_v34  ;;  %v135_v14 = vld [vmem:[#allocation2 + $0x78] sm:$0xff]  ;;  %v136_v15 = vld [vmem:[#allocation2 + $0x80] sm:$0xff]  ;;  %v137_v16 = vld [vmem:[#allocation2 + $0x88] sm:$0xff]  ;;  %s3795_s10 = sshll.u32 %s5095_s1, 4  ;;  %s3796_s10 = int_to_ptr.vmem [resolvable:$true] %s3795_s10 }
  0x9b   :  { %v120_v17 = vld [vmem:[#allocation2] sm:$0xff]  ;;  %v121_v18 = vld [vmem:[#allocation2 + $0x8] sm:$0xff]  ;;  %v122_v19 = vld [vmem:[#allocation2 + $0x10] sm:$0xff]  ;;  %s5047_s11 = scalar_lea.vmem %s3796_s10, 128  ;;  %p5052_p1 = scmp.lt.s32.totalorder %s3796_s10, %s3796_s10 }
  0x9c   :  { %2530 = vmatpush1.bf16.msra.mxu0 %v4329_v35  ;;  %v123_v33 = vld [vmem:[#allocation2 + $0x18] sm:$0xff]  ;;  %v124_v34 = vld [vmem:[#allocation2 + $0x20] sm:$0xff]  ;;  %p5048_p0 = scmp.ne.s32.totalorder %s3796_s10, %s5047_s11  ;;  %p5053_p2 = scmp.lt.s32.totalorder %s5047_s11, %s5047_s11 }
  0x9d   :  { %2653 = vmatpush1.bf16.msra.mxu1 %v4330_v36  ;;  %2531 = vmatprep.subr.bf16.mxu0 %v4331_v37 }
  0x9e   :  { %2654 = vmatprep.subr.bf16.mxu1 %v4333_v38  ;;  %p5054_p3 = por %p5053_p2, %p5052_p1 }
  0xa0   :  { %2532 = vmatpush1.bf16.msra.mxu0 %v4335_v39  ;;  %p5055_p4 = pnand %p5054_p3, %p5048_p0 }
  0xa1   :  { %2655 = vmatpush1.bf16.msra.mxu1 %v4336_v40  ;;  %2533 = vmatprep.subr.bf16.mxu0 %v4337_v41 }
  0xa2   :  { %2656 = vmatprep.subr.bf16.mxu1 %v4339_v42 }
  0xa4   :  { %2534 = vmatpush1.bf16.msra.mxu0 %v4341_v43 }
  0xa5   :  { %2657 = vmatpush1.bf16.msra.mxu1 %v4342_v44  ;;  %2535 = vmatprep.subr.bf16.mxu0 %v4343_v45 }
  0xa6   :  { %2658 = vmatprep.subr.bf16.mxu1 %v4345_v46 }
  0xa8   :  { %2536 = vmatpush1.bf16.msra.mxu0 %v4347_v47 }
  0xa9   :  { %2659 = vmatpush1.bf16.msra.mxu1 %v4348_v48  ;;  %2537 = vmatprep.subr.bf16.mxu0 %v4349_v49 }
  0xaa   :  { %2660 = vmatprep.subr.bf16.mxu1 %v4351_v50 }
  0xac   :  { %2538 = vmatpush1.bf16.msra.mxu0 %v4353_v51 }
  0xad   :  { %2661 = vmatpush1.bf16.msra.mxu1 %v4354_v52  ;;  %2539 = vmatprep.subr.bf16.mxu0 %v4355_v53 }
  0xae   :  { %2662 = vmatprep.subr.bf16.mxu1 %v4357_v54 }
  0xb0   :  { %2540 = vmatpush1.bf16.msra.mxu0 %v4359_v55 }
  0xb1   :  { %2663 = vmatpush1.bf16.msra.mxu1 %v4360_v56  ;;  %2541 = vmatprep.subr.bf16.mxu0 %v4361_v57 }
  0xb2   :  { %2664 = vmatprep.subr.bf16.mxu1 %v4363_v58 }
  0xb4   :  { %2542 = vmatpush1.bf16.msra.mxu0 %v4365_v59 }
  0xb5   :  { %2665 = vmatpush1.bf16.msra.mxu1 %v4366_v60  ;;  %2543 = vmatprep.subr.bf16.mxu0 %v4367_v61 }
  0xb6   :  { %2666 = vmatprep.subr.bf16.mxu1 %v4369_v62 }
  0xb8   :  { %2544 = vmatpush1.bf16.msra.mxu0 %v4371_v63 }
  0xb9   :  { %2667 = vmatpush1.bf16.msra.mxu1 %v4372_v0  ;;  %2545 = vmatprep.subr.bf16.mxu0 %v4373_v1 }
  0xba   :  { %2668 = vmatprep.subr.bf16.mxu1 %v4375_v2 }
  0xbc   :  { %2546 = vmatpush1.bf16.msra.mxu0 %v4377_v3 }
  0xbd   :  { %2669 = vmatpush1.bf16.msra.mxu1 %v4378_v4  ;;  %2547 = vmatprep.subr.bf16.mxu0 %v4379_v5  ;;  %v125_v5 = vld [vmem:[#allocation2 + $0x28] sm:$0xff] }
  0xbe   :  { %2670 = vmatprep.subr.bf16.mxu1 %v4381_v6 }
  0xc0   :  { %2548 = vmatpush1.bf16.msra.mxu0 %v4383_v7 }
  0xc1   :  { %2671 = vmatpush1.bf16.msra.mxu1 %v4384_v8  ;;  %2558 = vmatprep.subr.bf16.mxu0 %v4387_v9 }
  0xc2   :  { %2681 = vmatprep.subr.bf16.mxu1 %v4390_v10 }
 0x101   :  { %v189_v20 = vpop.permute.xlu1 %188  ;;  %v179_v21 = vpop.permute.xlu0 %178 }
 0x102   :  { %v228_v22 = vmul.f32 %v189_v20, %v132_v11  ;;  %v229_v23 = vmul.f32 %v189_v20, %v133_v12  ;;  %v230_v24 = vmul.f32 %v189_v20, %v134_v13  ;;  %v231_v25 = vmul.f32 %v189_v20, %v135_v14 }
 0x103   :  { %v232_v26 = vmul.f32 %v189_v20, %v136_v15  ;;  %v233_v27 = vmul.f32 %v189_v20, %v137_v16  ;;  %v216_v28 = vmul.f32 %v179_v21, %v120_v17  ;;  %v217_v37 = vmul.f32 %v179_v21, %v121_v18  ;;  %v138_v20 = vld [vmem:[#allocation2 + $0x90] sm:$0xff] }
 0x104   :  { %v336_v29 = vrot.slane %v228_v22, 4  ;;  %v342_v30 = vrot.slane %v229_v23, 4  ;;  %v348_v31 = vrot.slane %v230_v24, 4  ;;  %v354_v32 = vrot.slane %v231_v25, 4 }
 0x105   :  { %v360_v35 = vrot.slane %v232_v26, 4  ;;  %v366_v36 = vrot.slane %v233_v27, 4  ;;  %v5249_v38 = vmul.f32 %v179_v21, %v122_v19  ;;  %v5251_v45 = vmul.f32 %v179_v21, %v123_v33 }
 0x106   :  { %v337_v39 = vadd.f32 %v336_v29, %v228_v22  ;;  %v343_v40 = vadd.f32 %v342_v30, %v229_v23  ;;  %v349_v41 = vadd.f32 %v348_v31, %v230_v24  ;;  %v355_v42 = vadd.f32 %v354_v32, %v231_v25  ;;  %v139_v22 = vld [vmem:[#allocation2 + $0x98] sm:$0xff]  ;;  %v194_v29 = vpop.permute.xlu1 %193 }
 0x107   :  { %v361_v43 = vadd.f32 %v360_v35, %v232_v26  ;;  %v367_v44 = vadd.f32 %v366_v36, %v233_v27  ;;  %v5253_v46 = vmul.f32 %v179_v21, %v124_v34  ;;  %v264_v53 = vrot.slane %v216_v28, 4 }
 0x108   :  { %v338_v47 = vrot.slane %v337_v39, 2  ;;  %v344_v48 = vrot.slane %v343_v40, 2  ;;  %v350_v49 = vrot.slane %v349_v41, 2  ;;  %v356_v50 = vrot.slane %v355_v42, 2 }
 0x109   :  { %v362_v51 = vrot.slane %v361_v43, 2  ;;  %v368_v52 = vrot.slane %v367_v44, 2  ;;  %v270_v54 = vrot.slane %v217_v37, 4  ;;  %v265_v61 = vadd.f32 %v264_v53, %v216_v28 }
 0x10a   :  { %v339_v55 = vadd.f32 %v338_v47, %v337_v39  ;;  %v345_v56 = vadd.f32 %v344_v48, %v343_v40  ;;  %v351_v57 = vadd.f32 %v350_v49, %v349_v41  ;;  %v357_v58 = vadd.f32 %v356_v50, %v355_v42  ;;  %v141_v39 = vld [vmem:[#allocation2 + $0xa8] sm:$0xff]  ;;  %v142_v40 = vld [vmem:[#allocation2 + $0xb0] sm:$0xff] }
 0x10b   :  { %v363_v59 = vadd.f32 %v362_v51, %v361_v43  ;;  %v369_v60 = vadd.f32 %v368_v52, %v367_v44  ;;  %v271_v62 = vadd.f32 %v270_v54, %v217_v37  ;;  %v266_v6 = vrot.slane %v265_v61, 2  ;;  %v143_v43 = vld [vmem:[#allocation2 + $0xb8] sm:$0xff] }
 0x10c   :  { %v340_v63 = vrot.slane %v339_v55, 1  ;;  %v346_v0 = vrot.slane %v345_v56, 1  ;;  %v352_v1 = vrot.slane %v351_v57, 1  ;;  %v358_v2 = vrot.slane %v357_v58, 1 }
 0x10d   :  { %v364_v3 = vrot.slane %v363_v59, 1  ;;  %v370_v4 = vrot.slane %v369_v60, 1  ;;  %v272_v7 = vrot.slane %v271_v62, 2  ;;  %v267_v14 = vadd.f32 %v266_v6, %v265_v61 }
 0x10e   :  { %v341_v8 = vadd.f32 %v340_v63, %v339_v55  ;;  %v347_v9 = vadd.f32 %v346_v0, %v345_v56  ;;  %v353_v10 = vadd.f32 %v352_v1, %v351_v57  ;;  %v359_v11 = vadd.f32 %v358_v2, %v357_v58 }
 0x10f   :  { %v365_v12 = vadd.f32 %v364_v3, %v363_v59  ;;  %v5255_v13 = vadd.f32 %v370_v4, %v369_v60  ;;  %v273_v15 = vadd.f32 %v272_v7, %v271_v62  ;;  %v221_v19 = vmul.f32 %v179_v21, %v125_v5  ;;  %v140_v21 = vld [vmem:[#allocation2 + $0xa0] sm:$0xff] }
 0x110   :  { %v564_v16 = vpack.c.bf16 %v341_v8, %v341_v8  ;;  %v565_v17 = vpack.c.bf16 %v347_v9, %v347_v9  ;;  %v566_v18 = vpack.c.bf16 %v353_v10, %v353_v10  ;;  %v567_v23 = vpack.c.bf16 %v359_v11, %v359_v11 }
 0x111   :  { %v568_v24 = vpack.c.bf16 %v365_v12, %v365_v12  ;;  %v268_v25 = vrot.slane %v267_v14, 1  ;;  %v274_v26 = vrot.slane %v273_v15, 1  ;;  %v569_v27 = vpack.c.bf16 %v5255_v13, %v5255_v13 }
 0x112   :  { %v5259_v28 = vunpack.c.l.b16 %v564_v16  ;;  %v5261_v30 = vunpack.c.l.b16 %v565_v17  ;;  %v5263_v31 = vunpack.c.l.b16 %v566_v18  ;;  %v276_v34 = vrot.slane %v5249_v38, 4 }
 0x113   :  { %v5265_v32 = vadd.f32 %v268_v25, %v267_v14  ;;  %v5267_v33 = vadd.f32 %v274_v26, %v273_v15  ;;  %v282_v35 = vrot.slane %v5251_v45, 4  ;;  %v288_v36 = vrot.slane %v5253_v46, 4 }
 0x114   :  { %v294_v37 = vrot.slane %v221_v19, 4  ;;  %v5272_v41 = vunpack.c.l.b16 %v567_v23  ;;  %v5274_v42 = vunpack.c.l.b16 %v568_v24  ;;  %v234_v44 = vmul.f32 %v194_v29, %v138_v20  ;;  %v126_v23 = vld [vmem:[#allocation2 + $0x30] sm:$0xff]  ;;  %v127_v24 = vld [vmem:[#allocation2 + $0x38] sm:$0xff] }
 0x115   :  { %v235_v47 = vmul.f32 %v194_v29, %v139_v22  ;;  %v277_v48 = vadd.f32 %v276_v34, %v5249_v38  ;;  %v283_v49 = vadd.f32 %v282_v35, %v5251_v45  ;;  %v289_v50 = vadd.f32 %v288_v36, %v5253_v46 }
 0x116   :  { %5594 = vst [vmem:[#allocation20_spill] sm:$0xff] %v5274_v42  ;;  %v295_v51 = vadd.f32 %v294_v37, %v221_v19  ;;  %v552_v52 = vpack.c.bf16 %v5265_v32, %v5265_v32  ;;  %v553_v53 = vpack.c.bf16 %v5267_v33, %v5267_v33  ;;  %v236_v54 = vmul.f32 %v194_v29, %v140_v21  ;;  %v128_v33 = vld [vmem:[#allocation2 + $0x40] sm:$0xff]  ;;  %v129_v21 = vld [vmem:[#allocation2 + $0x48] sm:$0xff] }
 0x117   :  { %v237_v55 = vmul.f32 %v194_v29, %v141_v39  ;;  %v278_v56 = vrot.slane %v277_v48, 2  ;;  %v284_v57 = vrot.slane %v283_v49, 2  ;;  %v290_v58 = vrot.slane %v289_v50, 2  ;;  %v184_v39 = vpop.permute.xlu0 %183 }
 0x118   :  { %v296_v59 = vrot.slane %v295_v51, 2  ;;  %v238_v60 = vmul.f32 %v194_v29, %v142_v40  ;;  %v239_v61 = vmul.f32 %v194_v29, %v143_v43  ;;  %v372_v38 = vrot.slane %v234_v44, 4 }
 0x119   :  { %v378_v62 = vrot.slane %v235_v47, 4  ;;  %v279_v45 = vadd.f32 %v278_v56, %v277_v48  ;;  %v285_v63 = vadd.f32 %v284_v57, %v283_v49  ;;  %v291_v46 = vadd.f32 %v290_v58, %v289_v50 }
 0x11a   :  { %v297_v0 = vadd.f32 %v296_v59, %v295_v51  ;;  %v373_v1 = vadd.f32 %v372_v38, %v234_v44  ;;  %v384_v3 = vrot.slane %v236_v54, 4  ;;  %v390_v4 = vrot.slane %v237_v55, 4 }
 0x11b   :  { %v379_v2 = vadd.f32 %v378_v62, %v235_v47  ;;  %v280_v5 = vrot.slane %v279_v45, 1  ;;  %v286_v6 = vrot.slane %v285_v63, 1  ;;  %v292_v7 = vrot.slane %v291_v46, 1 }
 0x11c   :  { %v298_v8 = vrot.slane %v297_v0, 1  ;;  %v374_v9 = vrot.slane %v373_v1, 2  ;;  %v385_v11 = vadd.f32 %v384_v3, %v236_v54  ;;  %v391_v12 = vadd.f32 %v390_v4, %v237_v55  ;;  %v131_v55 = vld [vmem:[#allocation2 + $0x58] sm:$0xff] }
 0x11d   :  { %v380_v10 = vrot.slane %v379_v2, 2  ;;  %v281_v14 = vadd.f32 %v280_v5, %v279_v45  ;;  %v287_v15 = vadd.f32 %v286_v6, %v285_v63  ;;  %v293_v16 = vadd.f32 %v292_v7, %v291_v46 }
 0x11e   :  { %v299_v17 = vadd.f32 %v298_v8, %v297_v0  ;;  %v375_v18 = vadd.f32 %v374_v9, %v373_v1  ;;  %v386_v20 = vrot.slane %v385_v11, 2  ;;  %v392_v22 = vrot.slane %v391_v12, 2 }
 0x11f   :  { %v381_v19 = vadd.f32 %v380_v10, %v379_v2  ;;  %v554_v25 = vpack.c.bf16 %v281_v14, %v281_v14  ;;  %v555_v26 = vpack.c.bf16 %v287_v15, %v287_v15  ;;  %v556_v29 = vpack.c.bf16 %v293_v16, %v293_v16 }
 0x120   :  { %v557_v32 = vpack.c.bf16 %v299_v17, %v299_v17  ;;  %v5286_v34 = vunpack.c.l.b16 %v569_v27  ;;  %v376_v35 = vrot.slane %v375_v18, 1  ;;  %v387_v37 = vadd.f32 %v386_v20, %v385_v11  ;;  %v130_v27 = vld [vmem:[#allocation2 + $0x50] sm:$0xff] }
 0x121   :  { %v382_v36 = vrot.slane %v381_v19, 1  ;;  %v5288_v40 = vunpack.c.l.b16 %v552_v52  ;;  %v5290_v43 = vunpack.c.l.b16 %v553_v53  ;;  %v5292_v44 = vunpack.c.l.b16 %v554_v25 }
 0x122   :  { %5595 = vst [vmem:[#allocation21_spill] sm:$0xff] %v5286_v34  ;;  %v393_v47 = vadd.f32 %v392_v22, %v391_v12  ;;  %v5294_v48 = vunpack.c.l.b16 %v555_v26  ;;  %v5296_v49 = vunpack.c.l.b16 %v556_v29  ;;  %v5298_v50 = vunpack.c.l.b16 %v557_v32  ;;  %v150_v29 = vld [vmem:[#allocation2 + $0xf0] sm:$0xff]  ;;  %v151_v32 = vld [vmem:[#allocation2 + $0xf8] sm:$0xff] }
 0x123   :  { %v5300_v13 = vadd.f32 %v376_v35, %v375_v18  ;;  %v396_v51 = vrot.slane %v238_v60, 4  ;;  %v402_v54 = vrot.slane %v239_v61, 4  ;;  %v222_v56 = vmul.f32 %v184_v39, %v126_v23 }
 0x124   :  { %5596 = vst [vmem:[#allocation22_spill] sm:$0xff] %v5296_v49  ;;  %v223_v52 = vmul.f32 %v184_v39, %v127_v24  ;;  %v5302_v57 = vadd.f32 %v382_v36, %v381_v19  ;;  %v388_v53 = vrot.slane %v387_v37, 1  ;;  %v224_v58 = vmul.f32 %v184_v39, %v128_v33 }
 0x125   :  { %v225_v59 = vmul.f32 %v184_v39, %v129_v21  ;;  %v394_v38 = vrot.slane %v393_v47, 1  ;;  %v397_v62 = vadd.f32 %v396_v51, %v238_v60  ;;  %v403_v45 = vadd.f32 %v402_v54, %v239_v61  ;;  %v204_v51 = vpop.permute.xlu1 %203 }
 0x126   :  { %v226_v63 = vmul.f32 %v184_v39, %v130_v27  ;;  %v227_v46 = vmul.f32 %v184_v39, %v131_v55  ;;  %v300_v0 = vrot.slane %v222_v56, 4  ;;  %v306_v1 = vrot.slane %v223_v52, 4 }
 0x127   :  { %v312_v2 = vrot.slane %v224_v58, 4  ;;  %v398_v3 = vrot.slane %v397_v62, 2  ;;  %v404_v4 = vrot.slane %v403_v45, 2  ;;  %v318_v5 = vrot.slane %v225_v59, 4 }
 0x128   :  { %v324_v6 = vrot.slane %v226_v63, 4  ;;  %v389_v7 = vadd.f32 %v388_v53, %v387_v37  ;;  %v301_v8 = vadd.f32 %v300_v0, %v222_v56  ;;  %v307_v9 = vadd.f32 %v306_v1, %v223_v52  ;;  %v152_v53 = vld [vmem:[#allocation2 + $0x100] sm:$0xff] }
 0x129   :  { %v313_v10 = vadd.f32 %v312_v2, %v224_v58  ;;  %v5304_v11 = vadd.f32 %v394_v38, %v393_v47  ;;  %v399_v12 = vadd.f32 %v398_v3, %v397_v62  ;;  %v319_v14 = vadd.f32 %v318_v5, %v225_v59  ;;  %v153_v58 = vld [vmem:[#allocation2 + $0x108] sm:$0xff] }
 0x12a   :  { %v325_v15 = vadd.f32 %v324_v6, %v226_v63  ;;  %v302_v60 = vrot.slane %v301_v8, 2  ;;  %v308_v61 = vrot.slane %v307_v9, 2  ;;  %v330_v17 = vrot.slane %v227_v46, 4  ;;  %v154_v63 = vld [vmem:[#allocation2 + $0x110] sm:$0xff] }
 0x12b   :  { %v314_v16 = vrot.slane %v313_v10, 2  ;;  %v400_v18 = vrot.slane %v399_v12, 1  ;;  %v405_v19 = vadd.f32 %v404_v4, %v403_v45  ;;  %v320_v20 = vrot.slane %v319_v14, 2 }
 0x12c   :  { %v326_v22 = vrot.slane %v325_v15, 2  ;;  %v303_v23 = vadd.f32 %v302_v60, %v301_v8  ;;  %v309_v24 = vadd.f32 %v308_v61, %v307_v9  ;;  %v331_v26 = vadd.f32 %v330_v17, %v227_v46  ;;  %v155_v46 = vld [vmem:[#allocation2 + $0x118] sm:$0xff]  ;;  %v145_v17 = vld [vmem:[#allocation2 + $0xc8] sm:$0xff] }
 0x12d   :  { %v315_v25 = vadd.f32 %v314_v16, %v313_v10  ;;  %v401_v33 = vadd.f32 %v400_v18, %v399_v12  ;;  %v572_v21 = vpack.c.bf16 %v389_v7, %v389_v7  ;;  %v321_v35 = vadd.f32 %v320_v20, %v319_v14  ;;  %v144_v14 = vld [vmem:[#allocation2 + $0xc0] sm:$0xff] }
 0x12e   :  { %v327_v36 = vadd.f32 %v326_v22, %v325_v15  ;;  %v304_v37 = vrot.slane %v303_v23, 1  ;;  %v310_v39 = vrot.slane %v309_v24, 1  ;;  %v332_v27 = vrot.slane %v331_v26, 2 }
 0x12f   :  { %v316_v47 = vrot.slane %v315_v25, 1  ;;  %v406_v54 = vrot.slane %v405_v19, 1  ;;  %v574_v55 = vpack.c.bf16 %v401_v33, %v401_v33  ;;  %v322_v56 = vrot.slane %v321_v35, 1 }
 0x130   :  { %v328_v52 = vrot.slane %v327_v36, 1  ;;  %v305_v59 = vadd.f32 %v304_v37, %v303_v23  ;;  %v311_v38 = vadd.f32 %v310_v39, %v309_v24  ;;  %v333_v45 = vadd.f32 %v332_v27, %v331_v26  ;;  %v199_v23 = vpop.permute.xlu0 %198  ;;  %v147_v27 = vld [vmem:[#allocation2 + $0xd8] sm:$0xff] }
 0x131   :  { %v317_v62 = vadd.f32 %v316_v47, %v315_v25  ;;  %v323_v0 = vadd.f32 %v322_v56, %v321_v35  ;;  %v246_v2 = vmul.f32 %v204_v51, %v150_v29  ;;  %v247_v3 = vmul.f32 %v204_v51, %v151_v32 }
 0x132   :  { %v5306_v1 = vadd.f32 %v328_v52, %v327_v36  ;;  %v334_v4 = vrot.slane %v333_v45, 1  ;;  %v558_v5 = vpack.c.bf16 %v305_v59, %v305_v59  ;;  %v559_v6 = vpack.c.bf16 %v311_v38, %v311_v38  ;;  %v146_v36 = vld [vmem:[#allocation2 + $0xd0] sm:$0xff] }
 0x133   :  { %v560_v7 = vpack.c.bf16 %v317_v62, %v317_v62  ;;  %v5308_v8 = vadd.f32 %v406_v54, %v405_v19  ;;  %v5310_v9 = vunpack.c.l.b16 %v572_v21  ;;  %v248_v10 = vmul.f32 %v204_v51, %v152_v53  ;;  %v148_v54 = vld [vmem:[#allocation2 + $0xe0] sm:$0xff] }
 0x134   :  { %v249_v12 = vmul.f32 %v204_v51, %v153_v58  ;;  %v5312_v15 = vunpack.c.l.b16 %v574_v55  ;;  %v335_v60 = vadd.f32 %v334_v4, %v333_v45  ;;  %v561_v61 = vpack.c.bf16 %v323_v0, %v323_v0  ;;  %v149_v55 = vld [vmem:[#allocation2 + $0xe8] sm:$0xff] }
 0x135   :  { %v5316_v18 = vunpack.c.l.b16 %v558_v5  ;;  %v5318_v20 = vunpack.c.l.b16 %v559_v6  ;;  %v250_v22 = vmul.f32 %v204_v51, %v154_v63  ;;  %v251_v19 = vmul.f32 %v204_v51, %v155_v46 }
 0x136   :  { %5597 = vst [vmem:[#allocation23_spill] sm:$0xff] %v5312_v15  ;;  %v5320_v24 = vunpack.c.l.b16 %v560_v7  ;;  %v444_v25 = vrot.slane %v246_v2, 4  ;;  %v450_v26 = vrot.slane %v247_v3, 4  ;;  %v456_v29 = vrot.slane %v248_v10, 4 }
 0x137   :  { %v563_v32 = vpack.c.bf16 %v335_v60, %v335_v60  ;;  %v462_v33 = vrot.slane %v249_v12, 4  ;;  %v468_v21 = vrot.slane %v250_v22, 4  ;;  %v474_v35 = vrot.slane %v251_v19, 4 }
 0x138   :  { %v445_v37 = vadd.f32 %v444_v25, %v246_v2  ;;  %v451_v39 = vadd.f32 %v450_v26, %v247_v3  ;;  %v457_v47 = vadd.f32 %v456_v29, %v248_v10  ;;  %v240_v56 = vmul.f32 %v199_v23, %v144_v14  ;;  %v214_v25 = vpop.permute.xlu1 %213 }
 0x139   :  { %v463_v52 = vadd.f32 %v462_v33, %v249_v12  ;;  %v469_v51 = vadd.f32 %v468_v21, %v250_v22  ;;  %v475_v53 = vadd.f32 %v474_v35, %v251_v19  ;;  %v241_v58 = vmul.f32 %v199_v23, %v145_v17  ;;  %v163_v21 = vld [vmem:[#allocation2 + $0x158] sm:$0xff]  ;;  %v164_v35 = vld [vmem:[#allocation2 + $0x160] sm:$0xff] }
 0x13a   :  { %v446_v59 = vrot.slane %v445_v37, 2  ;;  %v452_v38 = vrot.slane %v451_v39, 2  ;;  %v458_v62 = vrot.slane %v457_v47, 2  ;;  %v242_v45 = vmul.f32 %v199_v23, %v146_v36  ;;  %v161_v36 = vld [vmem:[#allocation2 + $0x148] sm:$0xff] }
 0x13b   :  { %v464_v63 = vrot.slane %v463_v52, 2  ;;  %v470_v46 = vrot.slane %v469_v51, 2  ;;  %v476_v0 = vrot.slane %v475_v53, 2  ;;  %v243_v4 = vmul.f32 %v199_v23, %v147_v27  ;;  %v166_v27 = vld [vmem:[#allocation2 + $0x170] sm:$0xff] }
 0x13c   :  { %v5322_v5 = vunpack.c.l.b16 %v561_v61  ;;  %v5324_v2 = vunpack.c.l.b16 %v563_v32  ;;  %v5326_v3 = vadd.f32 %v458_v62, %v457_v47  ;;  %v244_v6 = vmul.f32 %v199_v23, %v148_v54  ;;  %v162_v61 = vld [vmem:[#allocation2 + $0x150] sm:$0xff]  ;;  %v167_v54 = vld [vmem:[#allocation2 + $0x178] sm:$0xff] }
 0x13d   :  { %v5328_v7 = vadd.f32 %v446_v59, %v445_v37  ;;  %v5330_v10 = vadd.f32 %v452_v38, %v451_v39  ;;  %v5332_v12 = vadd.f32 %v464_v63, %v463_v52  ;;  %v245_v14 = vmul.f32 %v199_v23, %v149_v55  ;;  %v165_v23 = vld [vmem:[#allocation2 + $0x168] sm:$0xff] }
 0x13e   :  { %5598 = vst [vmem:[#allocation24_spill] sm:$0xff] %v5324_v2  ;;  %v5334_v60 = vadd.f32 %v470_v46, %v469_v51  ;;  %v408_v17 = vrot.slane %v240_v56, 4  ;;  %v414_v22 = vrot.slane %v241_v58, 4  ;;  %v420_v19 = vrot.slane %v242_v45, 4 }
 0x13f   :  { %v5336_v26 = vadd.f32 %v476_v0, %v475_v53  ;;  %v426_v29 = vrot.slane %v243_v4, 4  ;;  %v432_v32 = vrot.slane %v244_v6, 4  ;;  %v438_v33 = vrot.slane %v245_v14, 4 }
 0x140   :  { %5599 = vst [vmem:[#allocation25_spill] sm:$0xff] %v5334_v60  ;;  %v409_v37 = vadd.f32 %v408_v17, %v240_v56  ;;  %v415_v39 = vadd.f32 %v414_v22, %v241_v58  ;;  %v421_v47 = vadd.f32 %v420_v19, %v242_v45  ;;  %v258_v59 = vmul.f32 %v214_v25, %v162_v61 }
 0x141   :  { %v427_v55 = vadd.f32 %v426_v29, %v243_v4  ;;  %v433_v52 = vadd.f32 %v432_v32, %v244_v6  ;;  %v439_v51 = vadd.f32 %v438_v33, %v245_v14  ;;  %v259_v63 = vmul.f32 %v214_v25, %v163_v21 }
 0x142   :  { %v410_v38 = vrot.slane %v409_v37, 2  ;;  %v416_v53 = vrot.slane %v415_v39, 2  ;;  %v422_v62 = vrot.slane %v421_v47, 2  ;;  %v260_v15 = vmul.f32 %v214_v25, %v164_v35 }
 0x143   :  { %v428_v46 = vrot.slane %v427_v55, 2  ;;  %v434_v0 = vrot.slane %v433_v52, 2  ;;  %v440_v16 = vrot.slane %v439_v51, 2  ;;  %v261_v45 = vmul.f32 %v214_v25, %v165_v23 }
 0x144   :  { %v5339_v42 = vadd.f32 %v410_v38, %v409_v37  ;;  %v5341_v56 = vadd.f32 %v416_v53, %v415_v39  ;;  %v423_v58 = vadd.f32 %v422_v62, %v421_v47  ;;  %v262_v6 = vmul.f32 %v214_v25, %v166_v27  ;;  %v157_v27 = vld [vmem:[#allocation2 + $0x128] sm:$0xff]  ;;  %v158_v38 = vld [vmem:[#allocation2 + $0x130] sm:$0xff] }
 0x145   :  { %v435_v4 = vadd.f32 %v434_v0, %v433_v52  ;;  %v263_v14 = vmul.f32 %v214_v25, %v167_v54  ;;  %v5344_v19 = vadd.f32 %v428_v46, %v427_v55  ;;  %v5346_v61 = vadd.f32 %v440_v16, %v439_v51  ;;  %v156_v52 = vld [vmem:[#allocation2 + $0x120] sm:$0xff]  ;;  %v209_v51 = vpop.permute.xlu0 %208 }
 0x146   :  { %v424_v22 = vrot.slane %v423_v58, 1  ;;  %v516_v29 = vrot.slane %v258_v59, 4  ;;  %v418_v33 = vrot.slane %v5341_v56, 1  ;;  %v522_v35 = vrot.slane %v259_v63, 4 }
 0x147   :  { %v436_v21 = vrot.slane %v435_v4, 1  ;;  %v528_v47 = vrot.slane %v260_v15, 4  ;;  %v534_v23 = vrot.slane %v261_v45, 4  ;;  %v540_v55 = vrot.slane %v262_v6, 4 }
 0x148   :  { %v425_v37 = vadd.f32 %v424_v22, %v423_v58  ;;  %v5350_v39 = vadd.f32 %v516_v29, %v258_v59  ;;  %v523_v54 = vadd.f32 %v522_v35, %v259_v63  ;;  %v546_v16 = vrot.slane %v263_v14, 4 }
 0x149   :  { %v5352_v25 = vadd.f32 %v436_v21, %v435_v4  ;;  %v529_v46 = vadd.f32 %v528_v47, %v260_v15  ;;  %v5355_v0 = vadd.f32 %v534_v23, %v261_v45  ;;  %v541_v22 = vadd.f32 %v540_v55, %v262_v6  ;;  %v159_v4 = vld [vmem:[#allocation2 + $0x138] sm:$0xff]  ;;  %v160_v21 = vld [vmem:[#allocation2 + $0x140] sm:$0xff] }
 0x14a   :  { %v578_v62 = vpack.c.bf16 %v425_v37, %v425_v37  ;;  %v5359_v29 = vadd.f32 %v546_v16, %v263_v14  ;;  %v524_v35 = vrot.slane %v523_v54, 2  ;;  %v252_v53 = vmul.f32 %v209_v51, %v156_v52 }
 0x14b   :  { %v530_v17 = vrot.slane %v529_v46, 2  ;;  %v542_v45 = vrot.slane %v541_v22, 2  ;;  %v253_v47 = vmul.f32 %v209_v51, %v157_v27  ;;  %v254_v6 = vmul.f32 %v209_v51, %v158_v38 }
 0x14c   :  { %v5363_v37 = vunpack.c.l.b16 %v578_v62  ;;  %v255_v14 = vmul.f32 %v209_v51, %v159_v4  ;;  %v256_v55 = vmul.f32 %v209_v51, %v160_v21  ;;  %v257_v59 = vmul.f32 %v209_v51, %v161_v36 }
 0x14d   :  { %v5366_v23 = vadd.f32 %v530_v17, %v529_v46  ;;  %v480_v63 = vrot.slane %v252_v53, 4  ;;  %v486_v58 = vrot.slane %v253_v47, 4  ;;  %v5369_v32 = vadd.f32 %v542_v45, %v541_v22 }
 0x14e   :  { %v492_v52 = vrot.slane %v254_v6, 4  ;;  %v498_v62 = vrot.slane %v255_v14, 4  ;;  %v504_v49 = vrot.slane %v256_v55, 4  ;;  %v510_v46 = vrot.slane %v257_v59, 4 }
 0x14f   :  { %v481_v27 = vadd.f32 %v480_v63, %v252_v53  ;;  %v487_v17 = vadd.f32 %v486_v58, %v253_v47  ;;  %v419_v16 = vadd.f32 %v418_v33, %v5341_v56  ;;  %v454_v45 = vrot.slane %v5330_v10, 1 }
 0x150   :  { %v493_v38 = vadd.f32 %v492_v52, %v254_v6  ;;  %v499_v4 = vadd.f32 %v498_v62, %v255_v14  ;;  %v505_v21 = vadd.f32 %v504_v49, %v256_v55  ;;  %v511_v22 = vadd.f32 %v510_v46, %v257_v59 }
 0x151   :  { %v482_v36 = vrot.slane %v481_v27, 2  ;;  %v488_v51 = vrot.slane %v487_v17, 2  ;;  %v525_v15 = vadd.f32 %v524_v35, %v523_v54  ;;  %v455_v47 = vadd.f32 %v454_v45, %v5330_v10 }
 0x152   :  { %v494_v60 = vrot.slane %v493_v38, 2  ;;  %v500_v34 = vrot.slane %v499_v4, 2  ;;  %v506_v2 = vrot.slane %v505_v21, 2  ;;  %v512_v63 = vrot.slane %v511_v22, 2 }
 0x153   :  { %v483_v53 = vadd.f32 %v482_v36, %v481_v27  ;;  %v489_v58 = vadd.f32 %v488_v51, %v487_v17  ;;  %v526_v6 = vrot.slane %v525_v15, 1  ;;  %v571_v55 = vpack.c.bf16 %v5302_v57, %v5302_v57 }
 0x154   :  { %v495_v49 = vadd.f32 %v494_v60, %v493_v38  ;;  %v5375_v56 = vadd.f32 %v500_v34, %v499_v4  ;;  %v507_v33 = vadd.f32 %v506_v2, %v505_v21  ;;  %v5377_v59 = vadd.f32 %v512_v63, %v511_v22 }
 0x155   :  { %v490_v14 = vrot.slane %v489_v58, 1  ;;  %v577_v52 = vpack.c.bf16 %v419_v16, %v419_v16  ;;  %v527_v62 = vadd.f32 %v526_v6, %v525_v15  ;;  %v583_v27 = vpack.c.bf16 %v455_v47, %v455_v47 }
 0x156   :  { %v496_v54 = vrot.slane %v495_v49, 1  ;;  %v508_v35 = vrot.slane %v507_v33, 1  ;;  %v987_v46 = vunpack.c.l.b16 %v571_v55  ;;  %v1030_v34 = vsel %vm1016_vm0, %v5318_v20, %v5290_v43 }
 0x157   :  { %v491_v17 = vadd.f32 %v490_v14, %v489_v58  ;;  %v993_v10 = vunpack.c.l.b16 %v577_v52  ;;  %v595_v38 = vpack.c.bf16 %v527_v62, %v527_v62  ;;  %v999_v4 = vunpack.c.l.b16 %v583_v27 }
 0x158   :  { %v5384_v2 = vadd.f32 %v496_v54, %v495_v49  ;;  %v5386_v60 = vadd.f32 %v508_v35, %v507_v33  ;;  %v1031_v57 = vsel %vm1018_vm1, %v5261_v30, %v1030_v34  ;;  %v5600_v15 = vrot.slane %v5339_v42, 1 }
 0x159   :  { %v589_v21 = vpack.c.bf16 %v491_v17, %v491_v17  ;;  %v448_v36 = vrot.slane %v5328_v7, 1  ;;  %v1011_v51 = vunpack.c.l.b16 %v595_v38  ;;  %v1032_v22 = vsel %vm1020_vm2, %v987_v46, %v1031_v57  ;;  %v4385_v57 = vld [vmem:[#allocation5 + $0x300] ss:$24 sps:$4 sm:$0xff]  }
 0x15a   :  { %v413_v16 = vadd.f32 %v5600_v15, %v5339_v42  ;;  %v484_v43 = vrot.slane %v483_v53, 1  ;;  %v5601_v20 = vrot.slane %v5350_v39, 2  ;;  %v1033_v63 = vsel %vm1022_vm3, %v993_v10, %v1032_v22  ;;  %v4388_v15 = vld [vmem:[#allocation5 + $0x308] ss:$24 sps:$4 sm:$0xff]  }
 0x15b   :  { %v1005_v58 = vunpack.c.l.b16 %v589_v21  ;;  %v449_v47 = vadd.f32 %v448_v36, %v5328_v7  ;;  %v570_v30 = vpack.c.bf16 %v5300_v13, %v5300_v13  ;;  %v1034_v42 = vsel %vm1024_vm4, %v999_v4, %v1033_v63  ;;  %v4393_v63 = vld [vmem:[#allocation5 + $0x334] ss:$24 sps:$4 sm:$0xff]  }
 0x15c   :  { %v519_v45 = vadd.f32 %v5601_v20, %v5350_v39  ;;  %v485_v49 = vadd.f32 %v484_v43, %v483_v53  ;;  %v576_v6 = vpack.c.bf16 %v413_v16, %v413_v16  ;;  %v1017_v39 = vsel %vm1016_vm0, %v5316_v18, %v5288_v40 }
 0x15d   :  { %v1035_v14 = vsel %vm1026_vm5, %v1005_v58, %v1034_v42  ;;  %v582_v55 = vpack.c.bf16 %v449_v47, %v449_v47  ;;  %v986_v52 = vunpack.c.l.b16 %v570_v30  ;;  %v1019_v53 = vsel %vm1018_vm1, %v5259_v28, %v1017_v39  ;;  %v4396_v47 = vld [vmem:[#allocation5 + $0x33c] ss:$24 sps:$4 sm:$0xff]  }
 0x15e   :  { %v520_v33 = vrot.slane %v519_v45, 1  ;;  %v1036_v54 = vsel %vm1028_vm6, %v1011_v51, %v1035_v14  ;;  %v588_v7 = vpack.c.bf16 %v485_v49, %v485_v49  ;;  %v992_v62 = vunpack.c.l.b16 %v576_v6 }
 0x15f   :  { %v5408_v27 = vpack.c.b16 %v1036_v54, %v1036_v54  ;;  %v998_v13 = vunpack.c.l.b16 %v582_v55  ;;  %v5602_v17 = vrot.slane %v5344_v19, 1  ;;  %v1021_v38 = vsel %vm1020_vm2, %v986_v52, %v1019_v53 }
 0x160   :  { %v521_v35 = vadd.f32 %v520_v33, %v519_v45  ;;  %v1004_v34 = vunpack.c.l.b16 %v588_v7  ;;  %v466_v40 = vrot.slane %v5332_v12, 1  ;;  %v1023_v18 = vsel %vm1022_vm3, %v992_v62, %v1021_v38  ;;  %v4394_v62 = vld [vmem:[#allocation5 + $0x338] ss:$24 sps:$4 sm:$0xff]  }
 0x161   :  { %v431_v46 = vadd.f32 %v5602_v17, %v5344_v19  ;;  %2549 = vmatprep.mubr.bf16.mxu0 %v5408_v27  ;;  %2672 = vmatprep.mubr.bf16.mxu1 %v5408_v27  ;;  %v502_v4 = vrot.slane %v5375_v56, 1  ;;  %v5603_v28 = vrot.slane %v5355_v0, 2  ;;  %v573_v19 = vpack.c.bf16 %v5304_v11, %v5304_v11 }
 0x162   :  { %v594_v10 = vpack.c.bf16 %v521_v35, %v521_v35  ;;  %v1025_v36 = vsel %vm1024_vm4, %v998_v13, %v1023_v18  ;;  %v467_v51 = vadd.f32 %v466_v40, %v5332_v12  ;;  %v1044_v42 = vsel %vm1016_vm0, %v5322_v5, %v5294_v48  ;;  %v4397_v40 = vld [vmem:[#allocation5 + $0x360] ss:$24 sps:$4 sm:$0xff]  }
 0x163   :  { %v537_v21 = vadd.f32 %v5603_v28, %v5355_v0  ;;  %v579_v22 = vpack.c.bf16 %v431_v46, %v431_v46  ;;  %v1027_v43 = vsel %vm1026_vm5, %v1004_v34, %v1025_v36  ;;  %v503_v20 = vadd.f32 %v502_v4, %v5375_v56  ;;  %v4402_v34 = vld [vmem:[#allocation5 + $0x36c] ss:$24 sps:$4 sm:$0xff]   ;;  %v4400_v18 = vld [vmem:[#allocation5 + $0x368] ss:$24 sps:$4 sm:$0xff]  }
 0x164   :  { %v1010_v16 = vunpack.c.l.b16 %v594_v10  ;;  %v989_v58 = vunpack.c.l.b16 %v573_v19  ;;  %v585_v30 = vpack.c.bf16 %v467_v51, %v467_v51  ;;  %v1045_v6 = vsel %vm1018_vm1, %v5272_v41, %v1044_v42  ;;  %v4399_v10 = vld [vmem:[#allocation5 + $0x364] ss:$24 sps:$4 sm:$0xff]   ;;  %v5610_v42 = vld [vmem:[#allocation24_spill] sm:$0xff] }
 0x165   :  { %v538_v45 = vrot.slane %v537_v21, 1  ;;  %v995_v11 = vunpack.c.l.b16 %v579_v22  ;;  %v591_v33 = vpack.c.bf16 %v503_v20, %v503_v20  ;;  %v5604_v55 = vrot.slane %v5326_v3, 1 }
 0x166   :  { %v1029_v0 = vsel %vm1028_vm6, %v1010_v16, %v1027_v43  ;;  %v1001_v56 = vunpack.c.l.b16 %v585_v30  ;;  %v1046_v14 = vsel %vm1020_vm2, %v989_v58, %v1045_v6  ;;  %v5605_v39 = vrot.slane %v5366_v23, 1  ;;  %v4405_v16 = vld [vmem:[#allocation5 + $0x394] ss:$24 sps:$4 sm:$0xff]  }
 0x167   :  { %v5434_v49 = vpack.c.b16 %v1029_v0, %v1029_v0  ;;  %v539_v12 = vadd.f32 %v538_v45, %v537_v21  ;;  %v461_v52 = vadd.f32 %v5604_v55, %v5326_v3  ;;  %v1007_v5 = vunpack.c.l.b16 %v591_v33  ;;  %v4391_v3 = vld [vmem:[#allocation5 + $0x330] ss:$24 sps:$4 sm:$0xff]  }
 0x168   :  { %v533_v54 = vadd.f32 %v5605_v39, %v5366_v23  ;;  %v1047_v35 = vsel %vm1022_vm3, %v995_v11, %v1046_v14  ;;  %v590_v41 = vpack.c.bf16 %v5384_v2, %v5384_v2  ;;  %v478_v23 = vrot.slane %v5336_v26, 1  ;;  %v4406_v33 = vld [vmem:[#allocation5 + $0x398] ss:$24 sps:$4 sm:$0xff]  }
 0x169   :  { %2550 = vmatmul.mubr.bf16.vlgmr.msra.gmra.mrb[0].mxu0 %v5434_v49  ;;  %2673 = vmatmul.mubr.bf16.vlgmr.msra.gmra.mrb[0].mxu1 %v5434_v49  ;;  %v597_v48 = vpack.c.bf16 %v539_v12, %v539_v12  ;;  %v1048_v7 = vsel %vm1024_vm4, %v1001_v56, %v1047_v35  ;;  %v584_v13 = vpack.c.bf16 %v461_v52, %v461_v52  ;;  %v5606_v19 = vrot.slane %v5346_v61, 1  ;;  %v4403_v12 = vld [vmem:[#allocation5 + $0x390] ss:$24 sps:$4 sm:$0xff]   ;;  %v4414_v52 = vld [vmem:[#allocation5 + $0x3cc] ss:$24 sps:$4 sm:$0xff]  }
 0x16a   :  { %2559 = vmatpush1.bf16.msra.mxu0 %v4385_v57  ;;  %2682 = vmatpush1.bf16.msra.mxu1 %v4388_v15  ;;  %v596_v53 = vpack.c.bf16 %v533_v54, %v533_v54  ;;  %v1049_v46 = vsel %vm1026_vm5, %v1007_v5, %v1048_v7  ;;  %v1006_v38 = vunpack.c.l.b16 %v590_v41  ;;  %v1037_v2 = vsel %vm1016_vm0, %v5320_v24, %v5292_v44  ;;  %v5611_v54 = vld [vmem:[#allocation21_spill] sm:$0xff] }
 0x16b   :  { %v1013_v17 = vunpack.c.l.b16 %v597_v48  ;;  %2560 = vmatprep.subr.bf16.mxu0 %v4393_v63  ;;  %2683 = vmatprep.subr.bf16.mxu1 %v4396_v47  ;;  %v1000_v4 = vunpack.c.l.b16 %v584_v13  ;;  %v1038_v21 = vsel %vm1018_vm1, %v5263_v31, %v1037_v2  ;;  %v443_v57 = vadd.f32 %v5606_v19, %v5346_v61  ;;  %v4408_v31 = vld [vmem:[#allocation5 + $0x39c] ss:$24 sps:$4 sm:$0xff]   ;;  %v5614_v13 = vld [vmem:[#allocation22_spill] sm:$0xff] }
 0x16c   :  { %v1012_v28 = vunpack.c.l.b16 %v596_v53  ;;  %v1039_v36 = vsel %vm1020_vm2, %v5310_v9, %v1038_v21  ;;  %v479_v51 = vadd.f32 %v478_v23, %v5336_v26  ;;  %v514_v44 = vrot.slane %v5377_v59, 1  ;;  %v5612_v5 = vld [vmem:[#allocation25_spill] sm:$0xff] }
 0x16d   :  { %v1050_v15 = vsel %vm1028_vm6, %v1013_v17, %v1049_v46  ;;  %v544_v24 = vrot.slane %v5369_v32, 1  ;;  %v1040_v61 = vsel %vm1022_vm3, %v5363_v37, %v1039_v36  ;;  %v5607_v43 = vrot.slane %v5359_v29, 2  ;;  %v4420_v21 = vld [vmem:[#allocation5 + $0x3fc] ss:$24 sps:$4 sm:$0xff]  }
 0x16e   :  { %v5467_v22 = vpack.c.b16 %v1050_v15, %v1050_v15  ;;  %2561 = vmatpush1.bf16.msra.mxu0 %v4391_v3  ;;  %2684 = vmatpush1.bf16.msra.mxu1 %v4394_v62  ;;  %v5608_v9 = vpack.c.bf16 %v5306_v1, %v5306_v1  ;;  %v1041_v45 = vsel %vm1024_vm4, %v1000_v4, %v1040_v61  ;;  %v5613_v35 = vrot.slane %v5612_v5, 1  ;;  %v5616_v4 = vld [vmem:[#allocation23_spill] sm:$0xff]  ;;  %v4423_v61 = vld [vmem:[#allocation5 + $0x424] ss:$24 sps:$4 sm:$0xff]  }
 0x16f   :  { %v549_v20 = vadd.f32 %v5607_v43, %v5359_v29  ;;  %2562 = vmatprep.subr.bf16.mxu0 %v4399_v10  ;;  %2685 = vmatprep.subr.bf16.mxu1 %v4402_v34  ;;  %v515_v58 = vadd.f32 %v514_v44, %v5377_v59  ;;  %v575_v63 = vpack.c.bf16 %v5308_v8, %v5308_v8  ;;  %v5615_v10 = vld [vmem:[#allocation20_spill] sm:$0xff]  ;;  %v4426_v43 = vld [vmem:[#allocation5 + $0x42c] ss:$24 sps:$4 sm:$0xff]  }
 0x170   :  { %v978_v26 = vunpack.c.l.b16 %v5608_v9  ;;  %2590 = vmatprep.mubr.bf16.mxu0 %v5467_v22  ;;  %2713 = vmatprep.mubr.bf16.mxu1 %v5467_v22  ;;  %v1042_v37 = vsel %vm1026_vm5, %v1006_v38, %v1041_v45  ;;  %v581_v47 = vpack.c.bf16 %v443_v57, %v443_v57  ;;  %v587_v0 = vpack.c.bf16 %v479_v51, %v479_v51  ;;  %v4409_v38 = vld [vmem:[#allocation5 + $0x3c0] ss:$24 sps:$4 sm:$0xff]   ;;  %v4415_v44 = vld [vmem:[#allocation5 + $0x3f0] ss:$24 sps:$4 sm:$0xff]   ;;  %v4429_v45 = vld [vmem:[#allocation5 + $0x454] ss:$24 sps:$4 sm:$0xff]  }
 0x171   :  { %v550_v29 = vrot.slane %v549_v20, 1  ;;  %v5609_v1 = vpack.c.bf16 %v5352_v25, %v5352_v25  ;;  %v5488_v11 = vsel %vm1028_vm6, %v1012_v28, %v1042_v37  ;;  %v593_v59 = vpack.c.bf16 %v515_v58, %v515_v58  ;;  %v4411_v25 = vld [vmem:[#allocation5 + $0x3c4] ss:$24 sps:$4 sm:$0xff]   ;;  %v4417_v28 = vld [vmem:[#allocation5 + $0x3f4] ss:$24 sps:$4 sm:$0xff]  }
 0x172   :  { %v1058_v8 = vsel %vm1016_vm0, %v5610_v42, %v5298_v50  ;;  %2563 = vmatpush1.bf16.msra.mxu0 %v4397_v40  ;;  %2686 = vmatpush1.bf16.msra.mxu1 %v4400_v18  ;;  %v991_v56 = vunpack.c.l.b16 %v575_v63  ;;  %v997_v14 = vunpack.c.l.b16 %v581_v47  ;;  %v1003_v55 = vunpack.c.l.b16 %v587_v0  ;;  %v4421_v9 = vld [vmem:[#allocation5 + $0x420] ss:$24 sps:$4 sm:$0xff]   ;;  %v4432_v58 = vld [vmem:[#allocation5 + $0x45c] ss:$24 sps:$4 sm:$0xff]   ;;  %v4427_v63 = vld [vmem:[#allocation5 + $0x450] ss:$24 sps:$4 sm:$0xff]  }
 0x173   :  { %v996_v30 = vunpack.c.l.b16 %v5609_v1  ;;  %v551_v6 = vadd.f32 %v550_v29, %v549_v20  ;;  %2564 = vmatprep.subr.bf16.mxu0 %v4405_v16  ;;  %2687 = vmatprep.subr.bf16.mxu1 %v4408_v31  ;;  %v1009_v39 = vunpack.c.l.b16 %v593_v59  ;;  %v1059_v48 = vsel %vm1018_vm1, %v5611_v54, %v1058_v8  ;;  %v4430_v37 = vld [vmem:[#allocation5 + $0x458] ss:$24 sps:$4 sm:$0xff]   ;;  %v4435_v29 = vld [vmem:[#allocation5 + $0x484] ss:$24 sps:$4 sm:$0xff]   ;;  %v4436_v1 = vld [vmem:[#allocation5 + $0x488] ss:$24 sps:$4 sm:$0xff]  }
 0x174   :  { %v473_v50 = vadd.f32 %v5613_v35, %v5612_v5  ;;  %v545_v41 = vadd.f32 %v544_v24, %v5369_v32  ;;  %v1060_v3 = vsel %vm1020_vm2, %v991_v56, %v1059_v48  ;;  %v592_v62 = vpack.c.bf16 %v5386_v60, %v5386_v60  ;;  %v4412_v32 = vld [vmem:[#allocation5 + $0x3c8] ss:$24 sps:$4 sm:$0xff]   ;;  %v4418_v24 = vld [vmem:[#allocation5 + $0x3f8] ss:$24 sps:$4 sm:$0xff]   ;;  %v4438_v47 = vld [vmem:[#allocation5 + $0x48c] ss:$24 sps:$4 sm:$0xff]  }
 0x175   :  { %v599_v7 = vpack.c.bf16 %v551_v6, %v551_v6  ;;  %v1051_v53 = vsel %vm1016_vm0, %v978_v26, %v5614_v13  ;;  %v1061_v23 = vsel %vm1022_vm3, %v997_v14, %v1060_v3  ;;  %v4424_v26 = vld [vmem:[#allocation5 + $0x428] ss:$24 sps:$4 sm:$0xff]   ;;  %v4444_v59 = vld [vmem:[#allocation5 + $0x4bc] ss:$24 sps:$4 sm:$0xff]   ;;  %v4442_v8 = vld [vmem:[#allocation5 + $0x4b8] ss:$24 sps:$4 sm:$0xff]  }
 0x176   :  { %v586_v17 = vpack.c.bf16 %v473_v50, %v473_v50  ;;  %v598_v46 = vpack.c.bf16 %v545_v41, %v545_v41  ;;  %v1052_v34 = vsel %vm1018_vm1, %v5615_v10, %v1051_v53  ;;  %2565 = vmatpush1.bf16.msra.mxu0 %v4403_v12  ;;  %2688 = vmatpush1.bf16.msra.mxu1 %v4406_v33  ;;  %v1008_v18 = vunpack.c.l.b16 %v592_v62  ;;  %v4433_v0 = vld [vmem:[#allocation5 + $0x480] ss:$24 sps:$4 sm:$0xff]   ;;  %v4439_v42 = vld [vmem:[#allocation5 + $0x4b0] ss:$24 sps:$4 sm:$0xff]   ;;  %v4447_v12 = vld [vmem:[#allocation5 + $0x4e4] ss:$24 sps:$4 sm:$0xff]  }
 0x177   :  { %v1015_v2 = vunpack.c.l.b16 %v599_v7  ;;  %v1062_v40 = vsel %vm1024_vm4, %v1003_v55, %v1061_v23  ;;  %v1053_v60 = vsel %vm1020_vm2, %v5616_v4, %v1052_v34  ;;  %2566 = vmatprep.subr.bf16.mxu0 %v4411_v25  ;;  %2689 = vmatprep.subr.bf16.mxu1 %v4414_v52  ;;  %v4450_v33 = vld [vmem:[#allocation5 + $0x4ec] ss:$24 sps:$4 sm:$0xff]   ;;  %v4445_v6 = vld [vmem:[#allocation5 + $0x4e0] ss:$24 sps:$4 sm:$0xff]   ;;  %v4456_v55 = vld [vmem:[#allocation5 + $0x51c] ss:$24 sps:$4 sm:$0xff]  }
 0x178   :  { %v1063_v19 = vsel %vm1026_vm5, %v1009_v39, %v1062_v40  ;;  %v1002_v57 = vunpack.c.l.b16 %v586_v17  ;;  %v1014_v15 = vunpack.c.l.b16 %v598_v46  ;;  %v1054_v16 = vsel %vm1022_vm3, %v996_v30, %v1053_v60  ;;  %v4441_v30 = vld [vmem:[#allocation5 + $0x4b4] ss:$24 sps:$4 sm:$0xff]   ;;  %v4448_v56 = vld [vmem:[#allocation5 + $0x4e8] ss:$24 sps:$4 sm:$0xff]   ;;  %v4454_v52 = vld [vmem:[#allocation5 + $0x518] ss:$24 sps:$4 sm:$0xff]  }
 0x179   :  { %v5513_v36 = vsel %vm1028_vm6, %v1015_v2, %v1063_v19  ;;  %v4453_v14 = vld [vmem:[#allocation5 + $0x514] ss:$24 sps:$4 sm:$0xff]   ;;  %v4451_v25 = vld [vmem:[#allocation5 + $0x510] ss:$24 sps:$4 sm:$0xff]   ;;  %v4459_v39 = vld [vmem:[#allocation5 + $0x544] ss:$24 sps:$4 sm:$0xff]   ;;  %v5522_v2 = vpack.c.b16 %v5488_v11, %v5488_v11 }
 0x17a   :  { %v1055_v51 = vsel %vm1024_vm4, %v1002_v57, %v1054_v16  ;;  %2567 = vmatpush1.bf16.msra.mxu0 %v4409_v38  ;;  %2690 = vmatpush1.bf16.msra.mxu1 %v4412_v32  ;;  %v4462_v54 = vld [vmem:[#allocation5 + $0x54c] ss:$24 sps:$4 sm:$0xff]   ;;  %v4457_v48 = vld [vmem:[#allocation5 + $0x540] ss:$24 sps:$4 sm:$0xff]   ;;  %v4468_v50 = vld [vmem:[#allocation5 + $0x57c] ss:$24 sps:$4 sm:$0xff]  }
 0x17b   :  { %v1056_v31 = vsel %vm1026_vm5, %v1008_v18, %v1055_v51  ;;  %2568 = vmatprep.subr.bf16.mxu0 %v4417_v28  ;;  %2691 = vmatprep.subr.bf16.mxu1 %v4420_v21  ;;  %v4460_v5 = vld [vmem:[#allocation5 + $0x548] ss:$24 sps:$4 sm:$0xff]   ;;  %v4465_v35 = vld [vmem:[#allocation5 + $0x574] ss:$24 sps:$4 sm:$0xff]   ;;  %v4466_v7 = vld [vmem:[#allocation5 + $0x578] ss:$24 sps:$4 sm:$0xff]   ;;  %v5526_v18 = vpack.c.b16 %v5513_v36, %v5513_v36 }
 0x17c   :  { %v5518_v20 = vsel %vm1028_vm6, %v1014_v15, %v1056_v31  ;;  %v4463_v41 = vld [vmem:[#allocation5 + $0x570] ss:$24 sps:$4 sm:$0xff]   ;;  %v4471_v3 = vld [vmem:[#allocation5 + $0x5a4] ss:$24 sps:$4 sm:$0xff]   ;;  %v4469_v13 = vld [vmem:[#allocation5 + $0x5a0] ss:$24 sps:$4 sm:$0xff]  }
 0x17d   :  { %v4474_v62 = vld [vmem:[#allocation5 + $0x5ac] ss:$24 sps:$4 sm:$0xff]   ;;  %v4472_v53 = vld [vmem:[#allocation5 + $0x5a8] ss:$24 sps:$4 sm:$0xff]   ;;  %v4480_v17 = vld [vmem:[#allocation5 + $0x5dc] ss:$24 sps:$4 sm:$0xff]  }
 0x17e   :  { %2569 = vmatpush1.bf16.msra.mxu0 %v4415_v44  ;;  %2692 = vmatpush1.bf16.msra.mxu1 %v4418_v24  ;;  %v4477_v23 = vld [vmem:[#allocation5 + $0x5d4] ss:$24 sps:$4 sm:$0xff]   ;;  %v4475_v46 = vld [vmem:[#allocation5 + $0x5d0] ss:$24 sps:$4 sm:$0xff]   ;;  %v4483_v34 = vld [vmem:[#allocation5 + $0x604] ss:$24 sps:$4 sm:$0xff]  }
 0x17f   :  { %2570 = vmatprep.subr.bf16.mxu0 %v4423_v61  ;;  %2693 = vmatprep.subr.bf16.mxu1 %v4426_v43  ;;  %v4478_v10 = vld [vmem:[#allocation5 + $0x5d8] ss:$24 sps:$4 sm:$0xff]   ;;  %v4486_v38 = vld [vmem:[#allocation5 + $0x60c] ss:$24 sps:$4 sm:$0xff]   ;;  %v4484_v40 = vld [vmem:[#allocation5 + $0x608] ss:$24 sps:$4 sm:$0xff]  }
 0x180   :  { %v4481_v32 = vld [vmem:[#allocation5 + $0x600] ss:$24 sps:$4 sm:$0xff]   ;;  %v4489_v4 = vld [vmem:[#allocation5 + $0x634] ss:$24 sps:$4 sm:$0xff]   ;;  %v4487_v28 = vld [vmem:[#allocation5 + $0x630] ss:$24 sps:$4 sm:$0xff]  }
 0x181   :  { %v4492_v60 = vld [vmem:[#allocation5 + $0x63c] ss:$24 sps:$4 sm:$0xff]   ;;  %v4490_v11 = vld [vmem:[#allocation5 + $0x638] ss:$24 sps:$4 sm:$0xff]   ;;  %v4498_v19 = vld [vmem:[#allocation5 + $0x66c] ss:$24 sps:$4 sm:$0xff]  }
 0x182   :  { %2571 = vmatpush1.bf16.msra.mxu0 %v4421_v9  ;;  %2694 = vmatpush1.bf16.msra.mxu1 %v4424_v26  ;;  %v4495_v21 = vld [vmem:[#allocation5 + $0x664] ss:$24 sps:$4 sm:$0xff]   ;;  %v4493_v57 = vld [vmem:[#allocation5 + $0x660] ss:$24 sps:$4 sm:$0xff]   ;;  %v4501_v16 = vld [vmem:[#allocation5 + $0x694] ss:$24 sps:$4 sm:$0xff]  }
 0x183   :  { %2572 = vmatprep.subr.bf16.mxu0 %v4429_v45  ;;  %2695 = vmatprep.subr.bf16.mxu1 %v4432_v58  ;;  %v4496_v15 = vld [vmem:[#allocation5 + $0x668] ss:$24 sps:$4 sm:$0xff]   ;;  %v4504_v36 = vld [vmem:[#allocation5 + $0x69c] ss:$24 sps:$4 sm:$0xff]   ;;  %v4502_v44 = vld [vmem:[#allocation5 + $0x698] ss:$24 sps:$4 sm:$0xff]  }
 0x184   :  { %v4499_v51 = vld [vmem:[#allocation5 + $0x690] ss:$24 sps:$4 sm:$0xff]   ;;  %v4507_v24 = vld [vmem:[#allocation5 + $0x6c4] ss:$24 sps:$4 sm:$0xff]   ;;  %v4505_v61 = vld [vmem:[#allocation5 + $0x6c0] ss:$24 sps:$4 sm:$0xff]  }
 0x185   :  { %v4510_v31 = vld [vmem:[#allocation5 + $0x6cc] ss:$24 sps:$4 sm:$0xff]   ;;  %v4508_v43 = vld [vmem:[#allocation5 + $0x6c8] ss:$24 sps:$4 sm:$0xff]   ;;  %v4516_v26 = vld [vmem:[#allocation5 + $0x6fc] ss:$24 sps:$4 sm:$0xff]  }
 0x186   :  { %2573 = vmatpush1.bf16.msra.mxu0 %v4427_v63  ;;  %2696 = vmatpush1.bf16.msra.mxu1 %v4430_v37  ;;  %v4513_v9 = vld [vmem:[#allocation5 + $0x6f4] ss:$24 sps:$4 sm:$0xff]   ;;  %v4511_v45 = vld [vmem:[#allocation5 + $0x6f0] ss:$24 sps:$4 sm:$0xff]   ;;  %v4519_v63 = vld [vmem:[#allocation5 + $0x724] ss:$24 sps:$4 sm:$0xff]  }
 0x187   :  { %2574 = vmatprep.subr.bf16.mxu0 %v4435_v29  ;;  %2697 = vmatprep.subr.bf16.mxu1 %v4438_v47  ;;  %v4514_v58 = vld [vmem:[#allocation5 + $0x6f8] ss:$24 sps:$4 sm:$0xff]   ;;  %v4522_v37 = vld [vmem:[#allocation5 + $0x72c] ss:$24 sps:$4 sm:$0xff]   ;;  %v4520_v47 = vld [vmem:[#allocation5 + $0x728] ss:$24 sps:$4 sm:$0xff]  }
 0x188   :  { %v4517_v29 = vld [vmem:[#allocation5 + $0x720] ss:$24 sps:$4 sm:$0xff]  }
 0x18a   :  { %2575 = vmatpush1.bf16.msra.mxu0 %v4433_v0  ;;  %2698 = vmatpush1.bf16.msra.mxu1 %v4436_v1  ;;  %v4525_v0 = vld [vmem:[#allocation5 + $0x754] ss:$24 sps:$4 sm:$0xff]  }
 0x18b   :  { %2576 = vmatprep.subr.bf16.mxu0 %v4441_v30  ;;  %2699 = vmatprep.subr.bf16.mxu1 %v4444_v59  ;;  %v4528_v1 = vld [vmem:[#allocation5 + $0x75c] ss:$24 sps:$4 sm:$0xff]   ;;  %v4523_v30 = vld [vmem:[#allocation5 + $0x750] ss:$24 sps:$4 sm:$0xff]  }
 0x18c   :  { %v4526_v59 = vld [vmem:[#allocation5 + $0x758] ss:$24 sps:$4 sm:$0xff]  }
 0x18e   :  { %2577 = vmatpush1.bf16.msra.mxu0 %v4439_v42  ;;  %2700 = vmatpush1.bf16.msra.mxu1 %v4442_v8  ;;  %v4531_v42 = vld [vmem:[#allocation5 + $0x784] ss:$24 sps:$4 sm:$0xff]  }
 0x18f   :  { %2578 = vmatprep.subr.bf16.mxu0 %v4447_v12  ;;  %2701 = vmatprep.subr.bf16.mxu1 %v4450_v33  ;;  %v4534_v8 = vld [vmem:[#allocation5 + $0x78c] ss:$24 sps:$4 sm:$0xff]   ;;  %v4529_v12 = vld [vmem:[#allocation5 + $0x780] ss:$24 sps:$4 sm:$0xff]  }
 0x190   :  { %v4532_v33 = vld [vmem:[#allocation5 + $0x788] ss:$24 sps:$4 sm:$0xff]  }
 0x192   :  { %2579 = vmatpush1.bf16.msra.mxu0 %v4445_v6  ;;  %2702 = vmatpush1.bf16.msra.mxu1 %v4448_v56  ;;  %v4537_v6 = vld [vmem:[#allocation5 + $0x7b4] ss:$24 sps:$4 sm:$0xff]  }
 0x193   :  { %2580 = vmatprep.subr.bf16.mxu0 %v4453_v14  ;;  %2703 = vmatprep.subr.bf16.mxu1 %v4456_v55  ;;  %v4540_v56 = vld [vmem:[#allocation5 + $0x7bc] ss:$24 sps:$4 sm:$0xff]   ;;  %v4535_v14 = vld [vmem:[#allocation5 + $0x7b0] ss:$24 sps:$4 sm:$0xff]  }
 0x194   :  { %v4538_v55 = vld [vmem:[#allocation5 + $0x7b8] ss:$24 sps:$4 sm:$0xff]  }
 0x196   :  { %2581 = vmatpush1.bf16.msra.mxu0 %v4451_v25  ;;  %2704 = vmatpush1.bf16.msra.mxu1 %v4454_v52  ;;  %v4543_v25 = vld [vmem:[#allocation5 + $0x7e4] ss:$24 sps:$4 sm:$0xff]  }
 0x197   :  { %2582 = vmatprep.subr.bf16.mxu0 %v4459_v39  ;;  %2705 = vmatprep.subr.bf16.mxu1 %v4462_v54  ;;  %v4546_v52 = vld [vmem:[#allocation5 + $0x7ec] ss:$24 sps:$4 sm:$0xff]   ;;  %v4541_v39 = vld [vmem:[#allocation5 + $0x7e0] ss:$24 sps:$4 sm:$0xff]  }
 0x198   :  { %v4544_v54 = vld [vmem:[#allocation5 + $0x7e8] ss:$24 sps:$4 sm:$0xff]  }
 0x19a   :  { %2583 = vmatpush1.bf16.msra.mxu0 %v4457_v48  ;;  %2706 = vmatpush1.bf16.msra.mxu1 %v4460_v5  ;;  %v4549_v48 = vld [vmem:[#allocation5 + $0x814] ss:$24 sps:$4 sm:$0xff]  }
 0x19b   :  { %2584 = vmatprep.subr.bf16.mxu0 %v4465_v35  ;;  %2707 = vmatprep.subr.bf16.mxu1 %v4468_v50  ;;  %v4552_v5 = vld [vmem:[#allocation5 + $0x81c] ss:$24 sps:$4 sm:$0xff]   ;;  %v4547_v35 = vld [vmem:[#allocation5 + $0x810] ss:$24 sps:$4 sm:$0xff]  }
 0x19c   :  { %v4550_v50 = vld [vmem:[#allocation5 + $0x818] ss:$24 sps:$4 sm:$0xff]  }
 0x19e   :  { %2585 = vmatpush1.bf16.msra.mxu0 %v4463_v41  ;;  %2708 = vmatpush1.bf16.msra.mxu1 %v4466_v7  ;;  %v4555_v41 = vld [vmem:[#allocation5 + $0x844] ss:$24 sps:$4 sm:$0xff]  }
 0x19f   :  { %2586 = vmatprep.subr.bf16.mxu0 %v4471_v3  ;;  %2709 = vmatprep.subr.bf16.mxu1 %v4474_v62  ;;  %v4558_v7 = vld [vmem:[#allocation5 + $0x84c] ss:$24 sps:$4 sm:$0xff]   ;;  %v4553_v3 = vld [vmem:[#allocation5 + $0x840] ss:$24 sps:$4 sm:$0xff]  }
 0x1a0   :  { %v4556_v62 = vld [vmem:[#allocation5 + $0x848] ss:$24 sps:$4 sm:$0xff]  }
 0x1a2   :  { %2587 = vmatpush1.bf16.msra.mxu0 %v4469_v13  ;;  %2710 = vmatpush1.bf16.msra.mxu1 %v4472_v53  ;;  %v4561_v13 = vld [vmem:[#allocation5 + $0x874] ss:$24 sps:$4 sm:$0xff]  }
 0x1a3   :  { %2588 = vmatprep.subr.bf16.mxu0 %v4477_v23  ;;  %2711 = vmatprep.subr.bf16.mxu1 %v4480_v17  ;;  %v4564_v53 = vld [vmem:[#allocation5 + $0x87c] ss:$24 sps:$4 sm:$0xff]   ;;  %v4559_v23 = vld [vmem:[#allocation5 + $0x870] ss:$24 sps:$4 sm:$0xff]  }
 0x1a4   :  { %v4562_v17 = vld [vmem:[#allocation5 + $0x878] ss:$24 sps:$4 sm:$0xff]  }
 0x1a6   :  { %2589 = vmatpush1.bf16.msra.mxu0 %v4475_v46  ;;  %2712 = vmatpush1.bf16.msra.mxu1 %v4478_v10  ;;  %v4567_v46 = vld [vmem:[#allocation5 + $0x8a4] ss:$24 sps:$4 sm:$0xff]  }
 0x1a7   :  { %2599 = vmatprep.subr.bf16.mxu0 %v4483_v34  ;;  %2722 = vmatprep.subr.bf16.mxu1 %v4486_v38  ;;  %v4570_v10 = vld [vmem:[#allocation5 + $0x8ac] ss:$24 sps:$4 sm:$0xff]   ;;  %v4565_v34 = vld [vmem:[#allocation5 + $0x8a0] ss:$24 sps:$4 sm:$0xff]  }
 0x1a8   :  { %v4568_v38 = vld [vmem:[#allocation5 + $0x8a8] ss:$24 sps:$4 sm:$0xff]  }
 0x1a9   :  { %2591 = vmatmul.mubr.bf16.vlgmr.msra.gmra.mrb[0].mxu0 %v5522_v2  ;;  %2714 = vmatmul.mubr.bf16.vlgmr.msra.gmra.mrb[0].mxu1 %v5522_v2 }
 0x1aa   :  { %2600 = vmatpush1.bf16.msra.mxu0 %v4481_v32  ;;  %2631 = vmatprep.mubr.bf16.mxu0 %v5526_v18  ;;  %v4573_v32 = vld [vmem:[#allocation5 + $0x8d4] ss:$24 sps:$4 sm:$0xff]  }
 0x1ab   :  { %2723 = vmatpush1.bf16.msra.mxu1 %v4484_v40  ;;  %2754 = vmatprep.mubr.bf16.mxu1 %v5526_v18  ;;  %v4576_v40 = vld [vmem:[#allocation5 + $0x8dc] ss:$24 sps:$4 sm:$0xff]  }
 0x1ac   :  { %2601 = vmatprep.subr.bf16.mxu0 %v4489_v4  ;;  %2724 = vmatprep.subr.bf16.mxu1 %v4492_v60  ;;  %v4571_v4 = vld [vmem:[#allocation5 + $0x8d0] ss:$24 sps:$4 sm:$0xff]  }
 0x1ad   :  { %v4574_v60 = vld [vmem:[#allocation5 + $0x8d8] ss:$24 sps:$4 sm:$0xff]  }
 0x1ae   :  { %2602 = vmatpush1.bf16.msra.mxu0 %v4487_v28  ;;  %v4579_v28 = vld [vmem:[#allocation5 + $0x14] ss:$24 sps:$4 sm:$0xff]  }
 0x1af   :  { %2725 = vmatpush1.bf16.msra.mxu1 %v4490_v11  ;;  %2603 = vmatprep.subr.bf16.mxu0 %v4495_v21  ;;  %v4577_v11 = vld [vmem:[#allocation5 + $0x10] ss:$24 sps:$4 sm:$0xff]   ;;  %v5534_v21 = vpack.c.b16 %v5518_v20, %v5518_v20  ;;  %v4591_v20 = vld [vmem:[#allocation5 + $0xd4] ss:$24 sps:$4 sm:$0xff]  }
 0x1b0   :  { %2726 = vmatprep.subr.bf16.mxu1 %v4498_v19  ;;  %v4582_v19 = vld [vmem:[#allocation5 + $0x44] ss:$24 sps:$4 sm:$0xff]  }
 0x1b2   :  { %2604 = vmatpush1.bf16.msra.mxu0 %v4493_v57  ;;  %v4580_v57 = vld [vmem:[#allocation5 + $0x40] ss:$24 sps:$4 sm:$0xff]  }
 0x1b3   :  { %2727 = vmatpush1.bf16.msra.mxu1 %v4496_v15  ;;  %2605 = vmatprep.subr.bf16.mxu0 %v4501_v16  ;;  %v4585_v15 = vld [vmem:[#allocation5 + $0x74] ss:$24 sps:$4 sm:$0xff]   ;;  %v4583_v16 = vld [vmem:[#allocation5 + $0x70] ss:$24 sps:$4 sm:$0xff]  }
 0x1b4   :  { %2728 = vmatprep.subr.bf16.mxu1 %v4504_v36  ;;  %v4588_v36 = vld [vmem:[#allocation5 + $0xa4] ss:$24 sps:$4 sm:$0xff]  }
 0x1b6   :  { %2606 = vmatpush1.bf16.msra.mxu0 %v4499_v51  ;;  %v4586_v51 = vld [vmem:[#allocation5 + $0xa0] ss:$24 sps:$4 sm:$0xff]  }
 0x1b7   :  { %2729 = vmatpush1.bf16.msra.mxu1 %v4502_v44  ;;  %2607 = vmatprep.subr.bf16.mxu0 %v4507_v24  ;;  %v4589_v44 = vld [vmem:[#allocation5 + $0xd0] ss:$24 sps:$4 sm:$0xff]   ;;  %v4594_v24 = vld [vmem:[#allocation5 + $0x104] ss:$24 sps:$4 sm:$0xff]  }
 0x1b8   :  { %2730 = vmatprep.subr.bf16.mxu1 %v4510_v31  ;;  %v4592_v31 = vld [vmem:[#allocation5 + $0x100] ss:$24 sps:$4 sm:$0xff]  }
 0x1ba   :  { %2608 = vmatpush1.bf16.msra.mxu0 %v4505_v61  ;;  %v4597_v61 = vld [vmem:[#allocation5 + $0x134] ss:$24 sps:$4 sm:$0xff]  }
 0x1bb   :  { %2731 = vmatpush1.bf16.msra.mxu1 %v4508_v43  ;;  %2609 = vmatprep.subr.bf16.mxu0 %v4513_v9  ;;  %v4600_v43 = vld [vmem:[#allocation5 + $0x164] ss:$24 sps:$4 sm:$0xff]   ;;  %v4598_v9 = vld [vmem:[#allocation5 + $0x160] ss:$24 sps:$4 sm:$0xff]  }
 0x1bc   :  { %2732 = vmatprep.subr.bf16.mxu1 %v4516_v26  ;;  %v4603_v26 = vld [vmem:[#allocation5 + $0x194] ss:$24 sps:$4 sm:$0xff]  }
 0x1be   :  { %2610 = vmatpush1.bf16.msra.mxu0 %v4511_v45  ;;  %v4601_v45 = vld [vmem:[#allocation5 + $0x190] ss:$24 sps:$4 sm:$0xff]  }
 0x1bf   :  { %2733 = vmatpush1.bf16.msra.mxu1 %v4514_v58  ;;  %2611 = vmatprep.subr.bf16.mxu0 %v4519_v63  ;;  %v4606_v58 = vld [vmem:[#allocation5 + $0x1c4] ss:$24 sps:$4 sm:$0xff]   ;;  %v4604_v63 = vld [vmem:[#allocation5 + $0x1c0] ss:$24 sps:$4 sm:$0xff]  }
 0x1c0   :  { %2734 = vmatprep.subr.bf16.mxu1 %v4522_v37  ;;  %v4609_v37 = vld [vmem:[#allocation5 + $0x1f4] ss:$24 sps:$4 sm:$0xff]  }
 0x1c2   :  { %2612 = vmatpush1.bf16.msra.mxu0 %v4517_v29  ;;  %v4703_v29 = vld [vmem:[#allocation8] ss:$8 sps:$4 sm:$0xff]  }
 0x1c3   :  { %2735 = vmatpush1.bf16.msra.mxu1 %v4520_v47  ;;  %2613 = vmatprep.subr.bf16.mxu0 %v4525_v0  ;;  %v4705_v47 = vld [vmem:[#allocation8 + $0x4] ss:$8 sps:$4 sm:$0xff]  }
 0x1c4   :  { %2736 = vmatprep.subr.bf16.mxu1 %v4528_v1  ;;  %v4607_v0 = vld [vmem:[#allocation5 + $0x1f0] ss:$24 sps:$4 sm:$0xff]   ;;  %v4612_v1 = vld [vmem:[#allocation5 + $0x224] ss:$24 sps:$4 sm:$0xff]  }
 0x1c6   :  { %2614 = vmatpush1.bf16.msra.mxu0 %v4523_v30  ;;  %v4709_v30 = vld [vmem:[#allocation8 + $0x10] ss:$8 sps:$4 sm:$0xff]  }
 0x1c7   :  { %2737 = vmatpush1.bf16.msra.mxu1 %v4526_v59  ;;  %2615 = vmatprep.subr.bf16.mxu0 %v4531_v42  ;;  %v4711_v59 = vld [vmem:[#allocation8 + $0x14] ss:$8 sps:$4 sm:$0xff]  }
 0x1c8   :  { %2738 = vmatprep.subr.bf16.mxu1 %v4534_v8  ;;  %v4610_v42 = vld [vmem:[#allocation5 + $0x220] ss:$24 sps:$4 sm:$0xff]   ;;  %v4615_v8 = vld [vmem:[#allocation5 + $0x254] ss:$24 sps:$4 sm:$0xff]  }
 0x1ca   :  { %2616 = vmatpush1.bf16.msra.mxu0 %v4529_v12  ;;  %v4715_v12 = vld [vmem:[#allocation8 + $0x20] ss:$8 sps:$4 sm:$0xff]  }
 0x1cb   :  { %2739 = vmatpush1.bf16.msra.mxu1 %v4532_v33  ;;  %2617 = vmatprep.subr.bf16.mxu0 %v4537_v6  ;;  %v4717_v33 = vld [vmem:[#allocation8 + $0x24] ss:$8 sps:$4 sm:$0xff]  }
 0x1cc   :  { %2740 = vmatprep.subr.bf16.mxu1 %v4540_v56  ;;  %v4613_v6 = vld [vmem:[#allocation5 + $0x250] ss:$24 sps:$4 sm:$0xff]   ;;  %v4618_v56 = vld [vmem:[#allocation5 + $0x284] ss:$24 sps:$4 sm:$0xff]  }
 0x1ce   :  { %2618 = vmatpush1.bf16.msra.mxu0 %v4535_v14  ;;  %v4721_v14 = vld [vmem:[#allocation8 + $0x30] ss:$8 sps:$4 sm:$0xff]  }
 0x1cf   :  { %2741 = vmatpush1.bf16.msra.mxu1 %v4538_v55  ;;  %2619 = vmatprep.subr.bf16.mxu0 %v4543_v25  ;;  %v4723_v55 = vld [vmem:[#allocation8 + $0x34] ss:$8 sps:$4 sm:$0xff]  }
 0x1d0   :  { %2742 = vmatprep.subr.bf16.mxu1 %v4546_v52  ;;  %v4616_v25 = vld [vmem:[#allocation5 + $0x280] ss:$24 sps:$4 sm:$0xff]   ;;  %v4621_v52 = vld [vmem:[#allocation5 + $0x2b4] ss:$24 sps:$4 sm:$0xff]  }
 0x1d2   :  { %2620 = vmatpush1.bf16.msra.mxu0 %v4541_v39  ;;  %v4727_v39 = vld [vmem:[#allocation8 + $0x40] ss:$8 sps:$4 sm:$0xff]  }
 0x1d3   :  { %2743 = vmatpush1.bf16.msra.mxu1 %v4544_v54  ;;  %2621 = vmatprep.subr.bf16.mxu0 %v4549_v48  ;;  %v4729_v54 = vld [vmem:[#allocation8 + $0x44] ss:$8 sps:$4 sm:$0xff]  }
 0x1d4   :  { %2744 = vmatprep.subr.bf16.mxu1 %v4552_v5  ;;  %v4619_v48 = vld [vmem:[#allocation5 + $0x2b0] ss:$24 sps:$4 sm:$0xff]   ;;  %v4624_v5 = vld [vmem:[#allocation5 + $0x2e4] ss:$24 sps:$4 sm:$0xff]  }
 0x1d6   :  { %2622 = vmatpush1.bf16.msra.mxu0 %v4547_v35  ;;  %v4733_v35 = vld [vmem:[#allocation8 + $0x50] ss:$8 sps:$4 sm:$0xff]  }
 0x1d7   :  { %2745 = vmatpush1.bf16.msra.mxu1 %v4550_v50  ;;  %2623 = vmatprep.subr.bf16.mxu0 %v4555_v41  ;;  %v4735_v50 = vld [vmem:[#allocation8 + $0x54] ss:$8 sps:$4 sm:$0xff]  }
 0x1d8   :  { %2746 = vmatprep.subr.bf16.mxu1 %v4558_v7  ;;  %v4622_v41 = vld [vmem:[#allocation5 + $0x2e0] ss:$24 sps:$4 sm:$0xff]   ;;  %v4627_v7 = vld [vmem:[#allocation5 + $0x314] ss:$24 sps:$4 sm:$0xff]  }
 0x1da   :  { %2624 = vmatpush1.bf16.msra.mxu0 %v4553_v3  ;;  %v4739_v3 = vld [vmem:[#allocation8 + $0x60] ss:$8 sps:$4 sm:$0xff]  }
 0x1db   :  { %2747 = vmatpush1.bf16.msra.mxu1 %v4556_v62  ;;  %2625 = vmatprep.subr.bf16.mxu0 %v4561_v13  ;;  %v4741_v62 = vld [vmem:[#allocation8 + $0x64] ss:$8 sps:$4 sm:$0xff]  }
 0x1dc   :  { %2748 = vmatprep.subr.bf16.mxu1 %v4564_v53  ;;  %v4625_v13 = vld [vmem:[#allocation5 + $0x310] ss:$24 sps:$4 sm:$0xff]   ;;  %v4630_v53 = vld [vmem:[#allocation5 + $0x344] ss:$24 sps:$4 sm:$0xff]  }
 0x1de   :  { %2626 = vmatpush1.bf16.msra.mxu0 %v4559_v23  ;;  %v4742_v23 = vld [vmem:[#allocation8 + $0x70] ss:$8 sps:$4 sm:$0xff]  }
 0x1df   :  { %2749 = vmatpush1.bf16.msra.mxu1 %v4562_v17  ;;  %2627 = vmatprep.subr.bf16.mxu0 %v4567_v46  ;;  %v4744_v17 = vld [vmem:[#allocation8 + $0x74] ss:$8 sps:$4 sm:$0xff]  }
 0x1e0   :  { %2750 = vmatprep.subr.bf16.mxu1 %v4570_v10  ;;  %v4628_v46 = vld [vmem:[#allocation5 + $0x340] ss:$24 sps:$4 sm:$0xff]   ;;  %v4747_v10 = vld [vmem:[#allocation8 + $0x84] ss:$8 sps:$4 sm:$0xff]  }
 0x1e2   :  { %2628 = vmatpush1.bf16.msra.mxu0 %v4565_v34  ;;  %v4633_v34 = vld [vmem:[#allocation5 + $0x374] ss:$24 sps:$4 sm:$0xff]  }
 0x1e3   :  { %2751 = vmatpush1.bf16.msra.mxu1 %v4568_v38  ;;  %2629 = vmatprep.subr.bf16.mxu0 %v4573_v32  ;;  %v4745_v38 = vld [vmem:[#allocation8 + $0x80] ss:$8 sps:$4 sm:$0xff]   ;;  %v4750_v32 = vld [vmem:[#allocation8 + $0x94] ss:$8 sps:$4 sm:$0xff]  }
 0x1e4   :  { %2752 = vmatprep.subr.bf16.mxu1 %v4576_v40  ;;  %v4631_v40 = vld [vmem:[#allocation5 + $0x370] ss:$24 sps:$4 sm:$0xff]  }
 0x1e6   :  { %2630 = vmatpush1.bf16.msra.mxu0 %v4571_v4  ;;  %v4636_v4 = vld [vmem:[#allocation5 + $0x3a4] ss:$24 sps:$4 sm:$0xff]  }
 0x1e7   :  { %2753 = vmatpush1.bf16.msra.mxu1 %v4574_v60  ;;  %2763 = vmatprep.subr.bf16.mxu0 %v4579_v28  ;;  %v4753_v60 = vld [vmem:[#allocation8 + $0xa4] ss:$8 sps:$4 sm:$0xff]   ;;  %v4634_v28 = vld [vmem:[#allocation5 + $0x3a0] ss:$24 sps:$4 sm:$0xff]  }
 0x1e8   :  { %3486 = vmatprep.subr.bf16.mxu1 %v4705_v47  ;;  %v4765_v47 = vld [vmem:[#allocation8 + $0xe4] ss:$8 sps:$4 sm:$0xff]  }
 0x1e9   :  { %2632 = vmatmul.mubr.bf16.vlgmr.msra.gmra.mrb[0].mxu0 %v5534_v21 }
 0x1ea   :  { %2755 = vmatmul.mubr.bf16.vlgmr.msra.gmra.mrb[0].mxu1 %v5534_v21  ;;  %2764 = vmatpush1.bf16.msra.mxu0 %v4577_v11  ;;  %v4751_v11 = vld [vmem:[#allocation8 + $0xa0] ss:$8 sps:$4 sm:$0xff]  }
 0x1eb   :  { %2795 = vmatprep.mubr.bf16.mxu0 %v5408_v27  ;;  %2765 = vmatprep.subr.bf16.mxu0 %v4582_v19  ;;  %v4595_v27 = vld [vmem:[#allocation5 + $0x130] ss:$24 sps:$4 sm:$0xff]   ;;  %v4756_v19 = vld [vmem:[#allocation8 + $0xb4] ss:$8 sps:$4 sm:$0xff]  }
 0x1ec   :  { %3487 = vmatpush1.bf16.msra.mxu1 %v4703_v29  ;;  %v4760_v29 = vld [vmem:[#allocation8 + $0xd0] ss:$8 sps:$4 sm:$0xff]  }
 0x1ed   :  { %3488 = vmatprep.subr.bf16.mxu1 %v4711_v59  ;;  %v4768_v59 = vld [vmem:[#allocation8 + $0xf4] ss:$8 sps:$4 sm:$0xff]  }
 0x1ee   :  { %2766 = vmatpush1.bf16.msra.mxu0 %v4580_v57  ;;  %v4637_v57 = vld [vmem:[#allocation5 + $0x3d0] ss:$24 sps:$4 sm:$0xff]  }
 0x1ef   :  { %2767 = vmatprep.subr.bf16.mxu0 %v4585_v15  ;;  %v4642_v15 = vld [vmem:[#allocation5 + $0x404] ss:$24 sps:$4 sm:$0xff]  }
 0x1f0   :  { %3489 = vmatpush1.bf16.msra.mxu1 %v4709_v30  ;;  %v4763_v30 = vld [vmem:[#allocation8 + $0xe0] ss:$8 sps:$4 sm:$0xff]  }
 0x1f1   :  { %3490 = vmatprep.subr.bf16.mxu1 %v4717_v33  ;;  %v4771_v33 = vld [vmem:[#allocation8 + $0x104] ss:$8 sps:$4 sm:$0xff]  }
 0x1f2   :  { %2768 = vmatpush1.bf16.msra.mxu0 %v4583_v16  ;;  %v4754_v16 = vld [vmem:[#allocation8 + $0xb0] ss:$8 sps:$4 sm:$0xff]  }
 0x1f3   :  { %2769 = vmatprep.subr.bf16.mxu0 %v4588_v36  ;;  %v4640_v36 = vld [vmem:[#allocation5 + $0x400] ss:$24 sps:$4 sm:$0xff]  }
 0x1f4   :  { %3491 = vmatpush1.bf16.msra.mxu1 %v4715_v12  ;;  %v4766_v12 = vld [vmem:[#allocation8 + $0xf0] ss:$8 sps:$4 sm:$0xff]  }
 0x1f5   :  { %3492 = vmatprep.subr.bf16.mxu1 %v4723_v55  ;;  %v4672_v55 = vld [vmem:[#allocation5 + $0x5e4] ss:$24 sps:$4 sm:$0xff]  }
 0x1f6   :  { %2770 = vmatpush1.bf16.msra.mxu0 %v4586_v51  ;;  %v4645_v51 = vld [vmem:[#allocation5 + $0x434] ss:$24 sps:$4 sm:$0xff]  }
 0x1f7   :  { %2771 = vmatprep.subr.bf16.mxu0 %v4591_v20  ;;  %v4643_v20 = vld [vmem:[#allocation5 + $0x430] ss:$24 sps:$4 sm:$0xff]  }
 0x1f8   :  { %3493 = vmatpush1.bf16.msra.mxu1 %v4721_v14  ;;  %v4667_v14 = vld [vmem:[#allocation5 + $0x5b0] ss:$24 sps:$4 sm:$0xff]  }
 0x1f9   :  { %3494 = vmatprep.subr.bf16.mxu1 %v4729_v54  ;;  %v4678_v54 = vld [vmem:[#allocation5 + $0x644] ss:$24 sps:$4 sm:$0xff]  }
 0x1fa   :  { %2772 = vmatpush1.bf16.msra.mxu0 %v4589_v44  ;;  %v4648_v44 = vld [vmem:[#allocation5 + $0x464] ss:$24 sps:$4 sm:$0xff]  }
 0x1fb   :  { %2773 = vmatprep.subr.bf16.mxu0 %v4594_v24  ;;  %v4646_v24 = vld [vmem:[#allocation5 + $0x460] ss:$24 sps:$4 sm:$0xff]  }
 0x1fc   :  { %3495 = vmatpush1.bf16.msra.mxu1 %v4727_v39  ;;  %v4673_v39 = vld [vmem:[#allocation5 + $0x610] ss:$24 sps:$4 sm:$0xff]  }
 0x1fd   :  { %3496 = vmatprep.subr.bf16.mxu1 %v4735_v50  ;;  %v4684_v50 = vld [vmem:[#allocation5 + $0x6a4] ss:$24 sps:$4 sm:$0xff]  }
 0x1fe   :  { %2774 = vmatpush1.bf16.msra.mxu0 %v4592_v31  ;;  %v4651_v31 = vld [vmem:[#allocation5 + $0x494] ss:$24 sps:$4 sm:$0xff]  }
 0x1ff   :  { %2775 = vmatprep.subr.bf16.mxu0 %v4597_v61  ;;  %v4649_v61 = vld [vmem:[#allocation5 + $0x490] ss:$24 sps:$4 sm:$0xff]  }
 0x200   :  { %3497 = vmatpush1.bf16.msra.mxu1 %v4733_v35  ;;  %v4679_v35 = vld [vmem:[#allocation5 + $0x670] ss:$24 sps:$4 sm:$0xff]  }
 0x201   :  { %3498 = vmatprep.subr.bf16.mxu1 %v4741_v62  ;;  %v4690_v62 = vld [vmem:[#allocation5 + $0x704] ss:$24 sps:$4 sm:$0xff]  }
 0x202   :  { %2776 = vmatpush1.bf16.msra.mxu0 %v4595_v27  ;;  %v4654_v27 = vld [vmem:[#allocation5 + $0x4c4] ss:$24 sps:$4 sm:$0xff]  }
 0x203   :  { %2777 = vmatprep.subr.bf16.mxu0 %v4600_v43  ;;  %v4652_v43 = vld [vmem:[#allocation5 + $0x4c0] ss:$24 sps:$4 sm:$0xff]  }
 0x204   :  { %3499 = vmatpush1.bf16.msra.mxu1 %v4739_v3  ;;  %v4685_v3 = vld [vmem:[#allocation5 + $0x6d0] ss:$24 sps:$4 sm:$0xff]  }
 0x205   :  { %3500 = vmatprep.subr.bf16.mxu1 %v4744_v17  ;;  %v4699_v17 = vld [vmem:[#allocation5 + $0x794] ss:$24 sps:$4 sm:$0xff]  }
 0x206   :  { %2778 = vmatpush1.bf16.msra.mxu0 %v4598_v9  ;;  %v4657_v9 = vld [vmem:[#allocation5 + $0x4f4] ss:$24 sps:$4 sm:$0xff]  }
 0x207   :  { %2779 = vmatprep.subr.bf16.mxu0 %v4603_v26  ;;  %v4757_v26 = vld [vmem:[#allocation8 + $0xc0] ss:$8 sps:$4 sm:$0xff]  }
 0x208   :  { %3501 = vmatpush1.bf16.msra.mxu1 %v4742_v23  ;;  %v4694_v23 = vld [vmem:[#allocation5 + $0x760] ss:$24 sps:$4 sm:$0xff]  }
 0x209   :  { %3502 = vmatprep.subr.bf16.mxu1 %v4747_v10  ;;  %v4702_v10 = vld [vmem:[#allocation5 + $0x7c4] ss:$24 sps:$4 sm:$0xff]  }
 0x20a   :  { %2780 = vmatpush1.bf16.msra.mxu0 %v4601_v45  ;;  %v4759_v45 = vld [vmem:[#allocation8 + $0xc4] ss:$8 sps:$4 sm:$0xff]  }
 0x20b   :  { %2781 = vmatprep.subr.bf16.mxu0 %v4606_v58  ;;  %v4655_v58 = vld [vmem:[#allocation5 + $0x4f0] ss:$24 sps:$4 sm:$0xff]  }
 0x20c   :  { %3503 = vmatpush1.bf16.msra.mxu1 %v4745_v38  ;;  %v4708_v38 = vld [vmem:[#allocation5 + $0x7f4] ss:$24 sps:$4 sm:$0xff]  }
 0x20d   :  { %3504 = vmatprep.subr.bf16.mxu1 %v4750_v32  ;;  %v4706_v32 = vld [vmem:[#allocation5 + $0x7f0] ss:$24 sps:$4 sm:$0xff]  }
 0x20e   :  { %2782 = vmatpush1.bf16.msra.mxu0 %v4604_v63  ;;  %v4762_v63 = vld [vmem:[#allocation8 + $0xd4] ss:$8 sps:$4 sm:$0xff]  }
 0x20f   :  { %2783 = vmatprep.subr.bf16.mxu0 %v4609_v37  ;;  %v4660_v37 = vld [vmem:[#allocation5 + $0x524] ss:$24 sps:$4 sm:$0xff]  }
 0x212   :  { %2784 = vmatpush1.bf16.msra.mxu0 %v4607_v0  ;;  %v4658_v0 = vld [vmem:[#allocation5 + $0x520] ss:$24 sps:$4 sm:$0xff]  }
 0x213   :  { %2785 = vmatprep.subr.bf16.mxu0 %v4612_v1  ;;  %v4663_v1 = vld [vmem:[#allocation5 + $0x554] ss:$24 sps:$4 sm:$0xff]  }
 0x216   :  { %2786 = vmatpush1.bf16.msra.mxu0 %v4610_v42  ;;  %v4661_v42 = vld [vmem:[#allocation5 + $0x550] ss:$24 sps:$4 sm:$0xff]  }
 0x217   :  { %2787 = vmatprep.subr.bf16.mxu0 %v4615_v8  ;;  %v4666_v8 = vld [vmem:[#allocation5 + $0x584] ss:$24 sps:$4 sm:$0xff]  }
 0x21a   :  { %2788 = vmatpush1.bf16.msra.mxu0 %v4613_v6  ;;  %v4664_v6 = vld [vmem:[#allocation5 + $0x580] ss:$24 sps:$4 sm:$0xff]  }
 0x21b   :  { %2789 = vmatprep.subr.bf16.mxu0 %v4618_v56  ;;  %v4669_v56 = vld [vmem:[#allocation5 + $0x5b4] ss:$24 sps:$4 sm:$0xff]  }
 0x21e   :  { %2790 = vmatpush1.bf16.msra.mxu0 %v4616_v25  ;;  %v4670_v25 = vld [vmem:[#allocation5 + $0x5e0] ss:$24 sps:$4 sm:$0xff]  }
 0x21f   :  { %2791 = vmatprep.subr.bf16.mxu0 %v4621_v52  ;;  %v4675_v52 = vld [vmem:[#allocation5 + $0x614] ss:$24 sps:$4 sm:$0xff]  }
 0x222   :  { %2792 = vmatpush1.bf16.msra.mxu0 %v4619_v48  ;;  %v4676_v48 = vld [vmem:[#allocation5 + $0x640] ss:$24 sps:$4 sm:$0xff]  }
 0x223   :  { %2793 = vmatprep.subr.bf16.mxu0 %v4624_v5  ;;  %v4681_v5 = vld [vmem:[#allocation5 + $0x674] ss:$24 sps:$4 sm:$0xff]  }
 0x226   :  { %2794 = vmatpush1.bf16.msra.mxu0 %v4622_v41  ;;  %v4682_v41 = vld [vmem:[#allocation5 + $0x6a0] ss:$24 sps:$4 sm:$0xff]  }
 0x227   :  { %2804 = vmatprep.subr.bf16.mxu0 %v4627_v7  ;;  %v4687_v7 = vld [vmem:[#allocation5 + $0x6d4] ss:$24 sps:$4 sm:$0xff]  }
 0x229   :  { %2796 = vmatmul.mubr.bf16.vlgmr.msra.gmra.mrb[4].mxu0 %v5434_v49  ;;  %v4748_v49 = vld [vmem:[#allocation8 + $0x90] ss:$8 sps:$4 sm:$0xff]  }
 0x22a   :  { %2805 = vmatpush1.bf16.msra.mxu0 %v4625_v13  ;;  %2836 = vmatprep.mubr.bf16.mxu0 %v5467_v22  ;;  %v4639_v22 = vld [vmem:[#allocation5 + $0x3d4] ss:$24 sps:$4 sm:$0xff]  }
 0x22b   :  { %2806 = vmatprep.subr.bf16.mxu0 %v4630_v53  ;;  %3505 = vmatpush1.bf16.msra.mxu1 %v4748_v49  ;;  %v4693_v13 = vld [vmem:[#allocation5 + $0x734] ss:$24 sps:$4 sm:$0xff]   ;;  %v4696_v53 = vld [vmem:[#allocation5 + $0x764] ss:$24 sps:$4 sm:$0xff]  }
 0x22c   :  { %3506 = vmatprep.subr.bf16.mxu1 %v4753_v60  ;;  %v4720_v49 = vld [vmem:[#allocation5 + $0x854] ss:$24 sps:$4 sm:$0xff]   ;;  %v4718_v60 = vld [vmem:[#allocation5 + $0x850] ss:$24 sps:$4 sm:$0xff]  }
 0x22e   :  { %2807 = vmatpush1.bf16.msra.mxu0 %v4628_v46  ;;  %v4697_v46 = vld [vmem:[#allocation5 + $0x790] ss:$24 sps:$4 sm:$0xff]  }
 0x22f   :  { %2808 = vmatprep.subr.bf16.mxu0 %v4633_v34  ;;  %3507 = vmatpush1.bf16.msra.mxu1 %v4751_v11  ;;  %v4700_v34 = vld [vmem:[#allocation5 + $0x7c0] ss:$24 sps:$4 sm:$0xff]   ;;  %v4732_v11 = vld [vmem:[#allocation5 + $0x8b4] ss:$24 sps:$4 sm:$0xff]  }
 0x230   :  { %3508 = vmatprep.subr.bf16.mxu1 %v4756_v19  ;;  %v4730_v19 = vld [vmem:[#allocation5 + $0x8b0] ss:$24 sps:$4 sm:$0xff]  }
 0x232   :  { %2809 = vmatpush1.bf16.msra.mxu0 %v4631_v40  ;;  %v4714_v40 = vld [vmem:[#allocation5 + $0x824] ss:$24 sps:$4 sm:$0xff]  }
 0x233   :  { %2810 = vmatprep.subr.bf16.mxu0 %v4636_v4  ;;  %3509 = vmatpush1.bf16.msra.mxu1 %v4754_v16  ;;  %v4712_v4 = vld [vmem:[#allocation5 + $0x820] ss:$24 sps:$4 sm:$0xff]   ;;  %v890_v16 = vlaneseq }
 0x234   :  { %3510 = vmatprep.subr.bf16.mxu1 %v4759_v45 }
 0x236   :  { %2811 = vmatpush1.bf16.msra.mxu0 %v4634_v28  ;;  %v4726_v28 = vld [vmem:[#allocation5 + $0x884] ss:$24 sps:$4 sm:$0xff]  }
 0x237   :  { %2812 = vmatprep.subr.bf16.mxu0 %v4639_v22  ;;  %3511 = vmatpush1.bf16.msra.mxu1 %v4757_v26  ;;  %v4724_v22 = vld [vmem:[#allocation5 + $0x880] ss:$24 sps:$4 sm:$0xff]  }
 0x238   :  { %3512 = vmatprep.subr.bf16.mxu1 %v4762_v63 }
 0x23a   :  { %2813 = vmatpush1.bf16.msra.mxu0 %v4637_v57  ;;  %v4738_v57 = vld [vmem:[#allocation5 + $0x8e4] ss:$24 sps:$4 sm:$0xff]  }
 0x23b   :  { %2814 = vmatprep.subr.bf16.mxu0 %v4642_v15  ;;  %3513 = vmatpush1.bf16.msra.mxu1 %v4760_v29  ;;  %v4736_v15 = vld [vmem:[#allocation5 + $0x8e0] ss:$24 sps:$4 sm:$0xff]  }
 0x23c   :  { %3514 = vmatprep.subr.bf16.mxu1 %v4765_v47 }
 0x23e   :  { %2815 = vmatpush1.bf16.msra.mxu0 %v4640_v36  ;;  %v5544_v36 = vshrl.u32 %v890_v16, 7  ;;  %v4822_v16 = vld [vmem:[#allocation8 + $0x214] ss:$8 sps:$4 sm:$0xff]  }
 0x23f   :  { %2816 = vmatprep.subr.bf16.mxu0 %v4645_v51  ;;  %3515 = vmatpush1.bf16.msra.mxu1 %v4763_v30 }
 0x240   :  { %3516 = vmatprep.subr.bf16.mxu1 %v4768_v59  ;;  %v892_v51 = vsub.s32 0, %v5544_v36 }
 0x242   :  { %2817 = vmatpush1.bf16.msra.mxu0 %v4643_v20  ;;  %v5547_v20 = vld [vmem:[#allocation7] sm:$0x3f] }
 0x243   :  { %2818 = vmatprep.subr.bf16.mxu0 %v4648_v44  ;;  %3517 = vmatpush1.bf16.msra.mxu1 %v4766_v12  ;;  %v896_v44 = vsub.s32 1, %v5544_v36 }
 0x244   :  { %3527 = vmatprep.subr.bf16.mxu1 %v4771_v33  ;;  %v4774_v33 = vld [vmem:[#allocation8 + $0x114] ss:$8 sps:$4 sm:$0xff]  }
 0x246   :  { %2819 = vmatpush1.bf16.msra.mxu0 %v4646_v24  ;;  %v904_v24 = vsub.s32 3, %v5544_v36 }
 0x247   :  { %2820 = vmatprep.subr.bf16.mxu0 %v4651_v31  ;;  %v893_v31 = vrot.slane %v5547_v20, %v892_v51 }
 0x24a   :  { %2821 = vmatpush1.bf16.msra.mxu0 %v4649_v61  ;;  %v897_v61 = vrot.slane %v5547_v20, %v896_v44 }
 0x24b   :  { %2822 = vmatprep.subr.bf16.mxu0 %v4654_v27 }
 0x24e   :  { %2823 = vmatpush1.bf16.msra.mxu0 %v4652_v43 }
 0x24f   :  { %2824 = vmatprep.subr.bf16.mxu0 %v4657_v9 }
 0x252   :  { %2825 = vmatpush1.bf16.msra.mxu0 %v4655_v58 }
 0x253   :  { %2826 = vmatprep.subr.bf16.mxu0 %v4660_v37 }
 0x256   :  { %2827 = vmatpush1.bf16.msra.mxu0 %v4658_v0 }
 0x257   :  { %2828 = vmatprep.subr.bf16.mxu0 %v4663_v1 }
 0x25a   :  { %2829 = vmatpush1.bf16.msra.mxu0 %v4661_v42 }
 0x25b   :  { %2830 = vmatprep.subr.bf16.mxu0 %v4666_v8  ;;  %v4769_v8 = vld [vmem:[#allocation8 + $0x100] ss:$8 sps:$4 sm:$0xff]  }
 0x25e   :  { %2831 = vmatpush1.bf16.msra.mxu0 %v4664_v6 }
 0x25f   :  { %2832 = vmatprep.subr.bf16.mxu0 %v4669_v56  ;;  %v4772_v56 = vld [vmem:[#allocation8 + $0x110] ss:$8 sps:$4 sm:$0xff]  }
 0x262   :  { %2833 = vmatpush1.bf16.msra.mxu0 %v4667_v14  ;;  %v4777_v14 = vld [vmem:[#allocation8 + $0x124] ss:$8 sps:$4 sm:$0xff]  }
 0x263   :  { %2834 = vmatprep.subr.bf16.mxu0 %v4672_v55  ;;  %v4775_v55 = vld [vmem:[#allocation8 + $0x120] ss:$8 sps:$4 sm:$0xff]  }
 0x266   :  { %2835 = vmatpush1.bf16.msra.mxu0 %v4670_v25  ;;  %v4780_v25 = vld [vmem:[#allocation8 + $0x134] ss:$8 sps:$4 sm:$0xff]  }
 0x267   :  { %2845 = vmatprep.subr.bf16.mxu0 %v4675_v52  ;;  %v4778_v52 = vld [vmem:[#allocation8 + $0x130] ss:$8 sps:$4 sm:$0xff]  }
 0x269   :  { %2837 = vmatmul.mubr.bf16.vlgmr.msra.gmra.mrb[4].mxu0 %v5522_v2  ;;  %v4688_v2 = vld [vmem:[#allocation5 + $0x700] ss:$24 sps:$4 sm:$0xff]  }
 0x26a   :  { %2846 = vmatpush1.bf16.msra.mxu0 %v4673_v39  ;;  %2877 = vmatprep.mubr.bf16.mxu0 %v5526_v18  ;;  %v4691_v18 = vld [vmem:[#allocation5 + $0x730] ss:$24 sps:$4 sm:$0xff]  }
 0x26b   :  { %2847 = vmatprep.subr.bf16.mxu0 %v4678_v54  ;;  %v4783_v39 = vld [vmem:[#allocation8 + $0x144] ss:$8 sps:$4 sm:$0xff]   ;;  %v4781_v54 = vld [vmem:[#allocation8 + $0x140] ss:$8 sps:$4 sm:$0xff]  }
 0x26e   :  { %2848 = vmatpush1.bf16.msra.mxu0 %v4676_v48  ;;  %v4786_v48 = vld [vmem:[#allocation8 + $0x154] ss:$8 sps:$4 sm:$0xff]  }
 0x26f   :  { %2849 = vmatprep.subr.bf16.mxu0 %v4681_v5  ;;  %v4784_v5 = vld [vmem:[#allocation8 + $0x150] ss:$8 sps:$4 sm:$0xff]  }
 0x272   :  { %2850 = vmatpush1.bf16.msra.mxu0 %v4679_v35  ;;  %v4789_v35 = vld [vmem:[#allocation8 + $0x164] ss:$8 sps:$4 sm:$0xff]  }
 0x273   :  { %2851 = vmatprep.subr.bf16.mxu0 %v4684_v50  ;;  %v4787_v50 = vld [vmem:[#allocation8 + $0x160] ss:$8 sps:$4 sm:$0xff]  }
 0x276   :  { %2852 = vmatpush1.bf16.msra.mxu0 %v4682_v41  ;;  %v4792_v41 = vld [vmem:[#allocation8 + $0x174] ss:$8 sps:$4 sm:$0xff]  }
 0x277   :  { %2853 = vmatprep.subr.bf16.mxu0 %v4687_v7  ;;  %v4790_v7 = vld [vmem:[#allocation8 + $0x170] ss:$8 sps:$4 sm:$0xff]  }
 0x27a   :  { %2854 = vmatpush1.bf16.msra.mxu0 %v4685_v3  ;;  %v4795_v3 = vld [vmem:[#allocation8 + $0x184] ss:$8 sps:$4 sm:$0xff]  }
 0x27b   :  { %2855 = vmatprep.subr.bf16.mxu0 %v4690_v62  ;;  %v4793_v62 = vld [vmem:[#allocation8 + $0x180] ss:$8 sps:$4 sm:$0xff]  }
 0x27e   :  { %2856 = vmatpush1.bf16.msra.mxu0 %v4688_v2  ;;  %v4798_v2 = vld [vmem:[#allocation8 + $0x194] ss:$8 sps:$4 sm:$0xff]  }
 0x27f   :  { %2857 = vmatprep.subr.bf16.mxu0 %v4693_v13  ;;  %v4796_v13 = vld [vmem:[#allocation8 + $0x190] ss:$8 sps:$4 sm:$0xff]  }
 0x282   :  { %2858 = vmatpush1.bf16.msra.mxu0 %v4691_v18  ;;  %v4801_v18 = vld [vmem:[#allocation8 + $0x1a4] ss:$8 sps:$4 sm:$0xff]  }
 0x283   :  { %2859 = vmatprep.subr.bf16.mxu0 %v4696_v53  ;;  %v900_v53 = vsub.s32 2, %v5544_v36 }
 0x286   :  { %2860 = vmatpush1.bf16.msra.mxu0 %v4694_v23  ;;  %v4799_v23 = vld [vmem:[#allocation8 + $0x1a0] ss:$8 sps:$4 sm:$0xff]  }
 0x287   :  { %2861 = vmatprep.subr.bf16.mxu0 %v4699_v17  ;;  %v4804_v17 = vld [vmem:[#allocation8 + $0x1b4] ss:$8 sps:$4 sm:$0xff]  }
 0x28a   :  { %2862 = vmatpush1.bf16.msra.mxu0 %v4697_v46  ;;  %v901_v46 = vrot.slane %v5547_v20, %v900_v53  ;;  %v908_v53 = vsub.s32 4, %v5544_v36 }
 0x28b   :  { %2863 = vmatprep.subr.bf16.mxu0 %v4702_v10  ;;  %v4802_v10 = vld [vmem:[#allocation8 + $0x1b0] ss:$8 sps:$4 sm:$0xff]  }
 0x28e   :  { %2864 = vmatpush1.bf16.msra.mxu0 %v4700_v34  ;;  %v4807_v34 = vld [vmem:[#allocation8 + $0x1c4] ss:$8 sps:$4 sm:$0xff]  }
 0x28f   :  { %2865 = vmatprep.subr.bf16.mxu0 %v4708_v38 }
 0x292   :  { %2866 = vmatpush1.bf16.msra.mxu0 %v4706_v32  ;;  %v4805_v32 = vld [vmem:[#allocation8 + $0x1c0] ss:$8 sps:$4 sm:$0xff]  }
 0x293   :  { %2867 = vmatprep.subr.bf16.mxu0 %v4714_v40  ;;  %v4810_v40 = vld [vmem:[#allocation8 + $0x1d4] ss:$8 sps:$4 sm:$0xff]  }
 0x296   :  { %2868 = vmatpush1.bf16.msra.mxu0 %v4712_v4  ;;  %v4808_v4 = vld [vmem:[#allocation8 + $0x1d0] ss:$8 sps:$4 sm:$0xff]  }
 0x297   :  { %2869 = vmatprep.subr.bf16.mxu0 %v4720_v49  ;;  %v4813_v49 = vld [vmem:[#allocation8 + $0x1e4] ss:$8 sps:$4 sm:$0xff]  }
 0x29a   :  { %2870 = vmatpush1.bf16.msra.mxu0 %v4718_v60  ;;  %v4811_v60 = vld [vmem:[#allocation8 + $0x1e0] ss:$8 sps:$4 sm:$0xff]  }
 0x29b   :  { %2871 = vmatprep.subr.bf16.mxu0 %v4726_v28  ;;  %v4816_v28 = vld [vmem:[#allocation8 + $0x1f4] ss:$8 sps:$4 sm:$0xff]  }
 0x29e   :  { %2872 = vmatpush1.bf16.msra.mxu0 %v4724_v22  ;;  %v4814_v22 = vld [vmem:[#allocation8 + $0x1f0] ss:$8 sps:$4 sm:$0xff]  }
 0x29f   :  { %2873 = vmatprep.subr.bf16.mxu0 %v4732_v11  ;;  %v4819_v11 = vld [vmem:[#allocation8 + $0x204] ss:$8 sps:$4 sm:$0xff]  }
 0x2a2   :  { %2874 = vmatpush1.bf16.msra.mxu0 %v4730_v19 }
 0x2a3   :  { %2875 = vmatprep.subr.bf16.mxu0 %v4738_v57  ;;  %v4817_v57 = vld [vmem:[#allocation8 + $0x200] ss:$8 sps:$4 sm:$0xff]  }
 0x2a6   :  { %2876 = vmatpush1.bf16.msra.mxu0 %v4736_v15 }
 0x2a9   :  { %2878 = vmatmul.mubr.bf16.vlgmr.msra.gmra.mrb[4].mxu0 %v5534_v21  ;;  %v905_v21 = vrot.slane %v5547_v20, %v904_v24  ;;  %v4865_v24 = vld [vmem:[#allocation11 + $0x40] sm:$0xff]  }
 0x2aa   :  { %4208 = vmatprep.subr.bf16.mxu0 %v4865_v24 }
 0x2bc   :  { %v2633_v27 = vpop.f32.mrb[0].mxu0 }
 0x2bd   :  { %v4230_v43 = vadd.f32 %v2633_v27, %v893_v31  ;;  %v5558_v9 = vpop.f32.mrb[0].mxu1  ;;  %v2635_v26 = vpop.f32.mrb[1].mxu0  ;;  %v4866_v31 = vld [vmem:[#allocation11] sm:$0xff]  }
 0x2be   :  { %v4231_v45 = vadd.f32 %v2635_v26, %v897_v61  ;;  %v2758_v58 = vpop.f32.mrb[1].mxu1  ;;  %v2637_v63 = vpop.f32.mrb[2].mxu0  ;;  %v4232_v38 = vadd.f32 %v5558_v9, %v901_v46  ;;  %v4867_v61 = vld [vmem:[#allocation11 + $0x48] sm:$0xff]   ;;  %4209 = vmatpush3.bf16.msra.mxu0 %v4866_v31  ;;  %v4869_v9 = vld [vmem:[#allocation11 + $0x50] sm:$0xff]  }
 0x2bf   :  { %v4233_v37 = vadd.f32 %v2758_v58, %v905_v21  ;;  %v2760_v29 = vpop.f32.mrb[2].mxu1  ;;  %v2638_v47 = vpop.f32.mrb[3].mxu0  ;;  %4881 = vtanh.f32 %v4230_v43  ;;  %v4820_v21 = vld [vmem:[#allocation8 + $0x210] ss:$8 sps:$4 sm:$0xff]   ;;  %v4825_v27 = vld [vmem:[#allocation8 + $0x224] ss:$8 sps:$4 sm:$0xff]   ;;  %4210 = vmatprep.subr.bf16.mxu0 %v4867_v61 }
 0x2c0   :  { %v2761_v0 = vpop.f32.mrb[3].mxu1  ;;  %4883 = vtanh.f32 %v4231_v45  ;;  %v4868_v43 = vld [vmem:[#allocation11 + $0x8] sm:$0xff]   ;;  %v4828_v45 = vld [vmem:[#allocation8 + $0x234] ss:$8 sps:$4 sm:$0xff]  }
 0x2c1   :  { %4885 = vtanh.f32 %v4233_v37  ;;  %v4823_v26 = vld [vmem:[#allocation8 + $0x220] ss:$8 sps:$4 sm:$0xff]   ;;  %v4870_v58 = vld [vmem:[#allocation11 + $0x10] sm:$0xff]   ;;  %v4831_v29 = vld [vmem:[#allocation8 + $0x244] ss:$8 sps:$4 sm:$0xff]  }
 0x2c2   :  { %4887 = vtanh.f32 %v4232_v38  ;;  %4211 = vmatpush3.bf16.msra.mxu0 %v4868_v43  ;;  %v4871_v63 = vld [vmem:[#allocation11 + $0x58] sm:$0xff]   ;;  %v4873_v0 = vld [vmem:[#allocation11 + $0x60] sm:$0xff]  }
 0x2c3   :  { %4212 = vmatprep.subr.bf16.mxu0 %v4869_v9  ;;  %v4826_v37 = vld [vmem:[#allocation8 + $0x230] ss:$8 sps:$4 sm:$0xff]  }
 0x2c4   :  { %v4872_v47 = vld [vmem:[#allocation11 + $0x18] sm:$0xff]  }
 0x2c6   :  { %4213 = vmatpush3.bf16.msra.mxu0 %v4870_v58 }
 0x2c7   :  { %4214 = vmatprep.subr.bf16.mxu0 %v4871_v63 }
 0x2c9   :  { %v4882_v1 = vpop.eup %4881 }
 0x2ca   :  { %v4884_v30 = vpop.eup %4883  ;;  %v2892_v12 = vpack.c.bf16 %v4882_v1, %v4882_v1  ;;  %v4829_v1 = vld [vmem:[#allocation8 + $0x240] ss:$8 sps:$4 sm:$0xff]   ;;  %4215 = vmatpush3.bf16.msra.mxu0 %v4872_v47 }
 0x2cb   :  { %v4886_v59 = vpop.eup %4885  ;;  %v2893_v42 = vpack.c.bf16 %v4884_v30, %v4884_v30  ;;  %v4834_v30 = vld [vmem:[#allocation8 + $0x254] ss:$8 sps:$4 sm:$0xff]   ;;  %4216 = vmatprep.subr.bf16.mxu0 %v4873_v0 }
 0x2cc   :  { %v2895_v6 = vpack.c.bf16 %v4886_v59, %v4886_v59  ;;  %v4888_v19 = vpop.eup %4887  ;;  %v4874_v59 = vld [vmem:[#allocation11 + $0x20] sm:$0xff]  }
 0x2cd   :  { %3518 = vmatprep.mubr.bf16.mxu1 %v2893_v42  ;;  %v2894_v15 = vpack.c.bf16 %v4888_v19, %v4888_v19  ;;  %v4875_v42 = vld [vmem:[#allocation11 + $0x68] sm:$0xff]   ;;  %v4878_v19 = vld [vmem:[#allocation11 + $0x30] sm:$0xff]  }
 0x2ce   :  { %3519 = vmatmul.mubr.bf16.vlgmr.msra.gmra.mrb[4].mxu1 %v2892_v12  ;;  %v4837_v12 = vld [vmem:[#allocation8 + $0x264] ss:$8 sps:$4 sm:$0xff]   ;;  %4217 = vmatpush3.bf16.msra.mxu0 %v4874_v59 }
 0x2cf   :  { %3528 = vmatpush1.bf16.msra.mxu1 %v4769_v8  ;;  %3559 = vmatprep.mubr.bf16.mxu1 %v2895_v6  ;;  %v4832_v8 = vld [vmem:[#allocation8 + $0x250] ss:$8 sps:$4 sm:$0xff]   ;;  %v4835_v6 = vld [vmem:[#allocation8 + $0x260] ss:$8 sps:$4 sm:$0xff]  }
 0x2d0   :  { %3529 = vmatprep.subr.bf16.mxu1 %v4774_v33  ;;  %v4876_v33 = vld [vmem:[#allocation11 + $0x28] sm:$0xff]   ;;  %4218 = vmatprep.subr.bf16.mxu0 %v4875_v42 }
 0x2d2   :  { %4219 = vmatpush3.bf16.msra.mxu0 %v4876_v33 }
 0x2d3   :  { %3530 = vmatpush1.bf16.msra.mxu1 %v4772_v56  ;;  %v4840_v56 = vld [vmem:[#allocation8 + $0x274] ss:$8 sps:$4 sm:$0xff]  }
 0x2d4   :  { %3531 = vmatprep.subr.bf16.mxu1 %v4777_v14  ;;  %v4838_v14 = vld [vmem:[#allocation8 + $0x270] ss:$8 sps:$4 sm:$0xff]  }
 0x2d7   :  { %3532 = vmatpush1.bf16.msra.mxu1 %v4775_v55  ;;  %v4843_v55 = vld [vmem:[#allocation8 + $0x284] ss:$8 sps:$4 sm:$0xff]  }
 0x2d8   :  { %3533 = vmatprep.subr.bf16.mxu1 %v4780_v25  ;;  %v4841_v25 = vld [vmem:[#allocation8 + $0x280] ss:$8 sps:$4 sm:$0xff]  }
 0x2db   :  { %3534 = vmatpush1.bf16.msra.mxu1 %v4778_v52  ;;  %v4846_v52 = vld [vmem:[#allocation8 + $0x294] ss:$8 sps:$4 sm:$0xff]  }
 0x2dc   :  { %3535 = vmatprep.subr.bf16.mxu1 %v4783_v39  ;;  %v4844_v39 = vld [vmem:[#allocation8 + $0x290] ss:$8 sps:$4 sm:$0xff]  }
 0x2df   :  { %3536 = vmatpush1.bf16.msra.mxu1 %v4781_v54  ;;  %v4849_v54 = vld [vmem:[#allocation8 + $0x2a4] ss:$8 sps:$4 sm:$0xff]  }
 0x2e0   :  { %3537 = vmatprep.subr.bf16.mxu1 %v4786_v48  ;;  %v4847_v48 = vld [vmem:[#allocation8 + $0x2a0] ss:$8 sps:$4 sm:$0xff]  }
 0x2e3   :  { %3538 = vmatpush1.bf16.msra.mxu1 %v4784_v5  ;;  %v4852_v5 = vld [vmem:[#allocation8 + $0x2b4] ss:$8 sps:$4 sm:$0xff]  }
 0x2e4   :  { %3539 = vmatprep.subr.bf16.mxu1 %v4789_v35  ;;  %v4850_v35 = vld [vmem:[#allocation8 + $0x2b0] ss:$8 sps:$4 sm:$0xff]  }
 0x2e7   :  { %3540 = vmatpush1.bf16.msra.mxu1 %v4787_v50  ;;  %v4855_v50 = vld [vmem:[#allocation8 + $0x2c4] ss:$8 sps:$4 sm:$0xff]  }
 0x2e8   :  { %3541 = vmatprep.subr.bf16.mxu1 %v4792_v41  ;;  %v4853_v41 = vld [vmem:[#allocation8 + $0x2c0] ss:$8 sps:$4 sm:$0xff]  }
 0x2eb   :  { %3542 = vmatpush1.bf16.msra.mxu1 %v4790_v7  ;;  %v4858_v7 = vld [vmem:[#allocation8 + $0x2d4] ss:$8 sps:$4 sm:$0xff]  }
 0x2ec   :  { %3543 = vmatprep.subr.bf16.mxu1 %v4795_v3  ;;  %v4856_v3 = vld [vmem:[#allocation8 + $0x2d0] ss:$8 sps:$4 sm:$0xff]  }
 0x2ef   :  { %3544 = vmatpush1.bf16.msra.mxu1 %v4793_v62  ;;  %v4861_v62 = vld [vmem:[#allocation8 + $0x2e4] ss:$8 sps:$4 sm:$0xff]  }
 0x2f0   :  { %3545 = vmatprep.subr.bf16.mxu1 %v4798_v2  ;;  %v4859_v2 = vld [vmem:[#allocation8 + $0x2e0] ss:$8 sps:$4 sm:$0xff]  }
 0x2f3   :  { %3546 = vmatpush1.bf16.msra.mxu1 %v4796_v13  ;;  %v4864_v13 = vld [vmem:[#allocation8 + $0x2f4] ss:$8 sps:$4 sm:$0xff]  }
 0x2f4   :  { %3547 = vmatprep.subr.bf16.mxu1 %v4801_v18  ;;  %v4862_v18 = vld [vmem:[#allocation8 + $0x2f0] ss:$8 sps:$4 sm:$0xff]  }
 0x2f7   :  { %3548 = vmatpush1.bf16.msra.mxu1 %v4799_v23  ;;  %v912_v23 = vsub.s32 5, %v5544_v36 }
 0x2f8   :  { %3549 = vmatprep.subr.bf16.mxu1 %v4804_v17  ;;  %v909_v17 = vrot.slane %v5547_v20, %v908_v53 }
 0x2f9   :  { %v913_v46 = vrot.slane %v5547_v20, %v912_v23  ;;  %v4880_v20 = vld [vmem:[#allocation11 + $0x38] sm:$0xff]  }
 0x2fb   :  { %3550 = vmatpush1.bf16.msra.mxu1 %v4802_v10 }
 0x2fc   :  { %3551 = vmatprep.subr.bf16.mxu1 %v4807_v34 }
 0x2ff   :  { %3552 = vmatpush1.bf16.msra.mxu1 %v4805_v32 }
 0x300   :  { %3553 = vmatprep.subr.bf16.mxu1 %v4810_v40 }
 0x303   :  { %3554 = vmatpush1.bf16.msra.mxu1 %v4808_v4 }
 0x304   :  { %3555 = vmatprep.subr.bf16.mxu1 %v4813_v49 }
 0x307   :  { %3556 = vmatpush1.bf16.msra.mxu1 %v4811_v60 }
 0x308   :  { %3557 = vmatprep.subr.bf16.mxu1 %v4816_v28 }
 0x30b   :  { %3558 = vmatpush1.bf16.msra.mxu1 %v4814_v22 }
 0x30c   :  { %3568 = vmatprep.subr.bf16.mxu1 %v4819_v11  ;;  %v4877_v11 = vld [vmem:[#allocation11 + $0x70] sm:$0xff]  }
 0x30d   :  { %4220 = vmatprep.subr.bf16.mxu0 %v4877_v11 }
 0x30e   :  { %3560 = vmatmul.mubr.bf16.vlgmr.msra.gmra.mrb[4].mxu1 %v2894_v15  ;;  %4221 = vmatpush3.bf16.msra.mxu0 %v4878_v19  ;;  %v2994_v15 = vld [vmem:[#allocation10] sm:$0x3] }
 0x30f   :  { %3569 = vmatpush1.bf16.msra.mxu1 %v4817_v57  ;;  %v4879_v57 = vld [vmem:[#allocation11 + $0x78] sm:$0xff]   ;;  %v3003_v24 = vrot.slane %v2994_v15, %v896_v44 }
 0x310   :  { %3570 = vmatprep.subr.bf16.mxu1 %v4822_v16  ;;  %4222 = vmatprep.subr.bf16.mxu0 %v4879_v57  ;;  %v2999_v16 = vrot.slane %v2994_v15, %v892_v51 }
 0x312   :  { %4223 = vmatpush3.bf16.msra.mxu0 %v4880_v20 }
 0x313   :  { %3571 = vmatpush1.bf16.msra.mxu1 %v4820_v21 }
 0x314   :  { %3572 = vmatprep.subr.bf16.mxu1 %v4825_v27 }
 0x317   :  { %3573 = vmatpush1.bf16.msra.mxu1 %v4823_v26 }
 0x318   :  { %3574 = vmatprep.subr.bf16.mxu1 %v4828_v45 }
 0x31b   :  { %3575 = vmatpush1.bf16.msra.mxu1 %v4826_v37 }
 0x31c   :  { %3576 = vmatprep.subr.bf16.mxu1 %v4831_v29  ;;  %v4191_v29 = vld [vmem:[#allocation13] ss:$0 sm:$0xff] }
 0x31f   :  { %3577 = vmatpush1.bf16.msra.mxu1 %v4829_v1 }
 0x320   :  { %3578 = vmatprep.subr.bf16.mxu1 %v4834_v30 }
 0x323   :  { %3579 = vmatpush1.bf16.msra.mxu1 %v4832_v8 }
 0x324   :  { %3580 = vmatprep.subr.bf16.mxu1 %v4837_v12 }
 0x327   :  { %3581 = vmatpush1.bf16.msra.mxu1 %v4835_v6 }
 0x328   :  { %3582 = vmatprep.subr.bf16.mxu1 %v4840_v56 }
 0x32b   :  { %3583 = vmatpush1.bf16.msra.mxu1 %v4838_v14 }
 0x32c   :  { %3584 = vmatprep.subr.bf16.mxu1 %v4843_v55 }
 0x32f   :  { %3585 = vmatpush1.bf16.msra.mxu1 %v4841_v25 }
 0x330   :  { %3586 = vmatprep.subr.bf16.mxu1 %v4846_v52 }
 0x333   :  { %3587 = vmatpush1.bf16.msra.mxu1 %v4844_v39 }
 0x334   :  { %3588 = vmatprep.subr.bf16.mxu1 %v4849_v54 }
 0x337   :  { %3589 = vmatpush1.bf16.msra.mxu1 %v4847_v48 }
 0x338   :  { %3590 = vmatprep.subr.bf16.mxu1 %v4852_v5 }
 0x33b   :  { %3591 = vmatpush1.bf16.msra.mxu1 %v4850_v35 }
 0x33c   :  { %3592 = vmatprep.subr.bf16.mxu1 %v4855_v50 }
 0x33f   :  { %3593 = vmatpush1.bf16.msra.mxu1 %v4853_v41 }
 0x340   :  { %3594 = vmatprep.subr.bf16.mxu1 %v4858_v7 }
 0x343   :  { %3595 = vmatpush1.bf16.msra.mxu1 %v4856_v3 }
 0x344   :  { %3596 = vmatprep.subr.bf16.mxu1 %v4861_v62 }
 0x347   :  { %3597 = vmatpush1.bf16.msra.mxu1 %v4859_v2 }
 0x348   :  { %3598 = vmatprep.subr.bf16.mxu1 %v4864_v13 }
 0x34b   :  { %3599 = vmatpush1.bf16.msra.mxu1 %v4862_v18 }
 0x37c   :  { %v2879_v10 = vpop.f32.mrb[4].mxu0 }
 0x37d   :  { %v4234_v34 = vadd.f32 %v2879_v10, %v909_v17  ;;  %v2881_v38 = vpop.f32.mrb[5].mxu0 }
 0x37e   :  { %v4235_v32 = vadd.f32 %v2881_v38, %v913_v46  ;;  %v2883_v40 = vpop.f32.mrb[6].mxu0 }
 0x37f   :  { %4889 = vtanh.f32 %v4234_v34  ;;  %v2884_v4 = vpop.f32.mrb[7].mxu0 }
 0x380   :  { %4891 = vtanh.f32 %v4235_v32 }
 0x389   :  { %v4890_v49 = vpop.eup %4889 }
 0x38a   :  { %v4892_v60 = vpop.eup %4891  ;;  %v2896_v22 = vpack.c.bf16 %v4890_v49, %v4890_v49 }
 0x38b   :  { %v2897_v28 = vpack.c.bf16 %v4892_v60, %v4892_v60 }
 0x38d   :  { %3600 = vmatprep.mubr.bf16.mxu1 %v2897_v28 }
 0x38e   :  { %3601 = vmatmul.mubr.bf16.vlgmr.msra.gmra.mrb[4].mxu1 %v2896_v22 }
 0x461   :  { %v3602_v31 = vpop.f32.mrb[4].mxu1 }
 0x462   :  { %v4236_v61 = vadd.f32 %v3602_v31, %v2999_v16  ;;  %v3604_v21 = vpop.f32.mrb[5].mxu1 }
 0x463   :  { %v4237_v27 = vadd.f32 %v3604_v21, %v3003_v24  ;;  %v3606_v43 = vpop.f32.mrb[6].mxu1 }
 0x464   :  { %v3609_v9 = vmax.f32 %v4236_v61, 0.0  ;;  %v3607_v26 = vpop.f32.mrb[7].mxu1 }
 0x465   :  { %v3610_v45 = vmax.f32 %v4237_v27, 0.0 }
 0x466   :  { %v3611_v63 = vpack.c.bf16 %v3609_v9, %v3609_v9 }
 0x467   :  { %v3612_v58 = vpack.c.bf16 %v3610_v45, %v3610_v45 }
 0x469   :  { %3780 = vmatprep.mubr.bf16.mxu0 %v3612_v58 }
 0x46a   :  { %3781 = vmatmul.mubr.bf16.vlgmr.msra.gmra.mrb[8].mxu0 %v3611_v63 }
 0x53d   :  { %v4224_v37 = vpop.f32.mrb[8].mxu0 }
 0x53e   :  { %v4225_v47 = vpop.f32.mrb[9].mxu0 }
 0x53f   :  { %v4226_v51 = vadd.f32 %v4225_v47, %v4224_v37  ;;  %v4227_v36 = vpop.f32.mrb[10].mxu0 }
 0x540   :  { %v4228_v44 = vpop.f32.mrb[11].mxu0 }
 0x541   :  { %v3783_v0 = vadd.f32 %v4226_v51, %v4191_v29 }
 0x543   :  { %3788 = vst [vmem:[#allocation14] sm:$0xff] %v3783_v0 }
 0x544   :  { %5058 = shalt.err (!%p5055_p4)
}
 0x545   :  { %s5059_s14 = scalar_lea.hbm %s5591_s8, 128 }
 0x546   :  { %p5060_p5 = scmp.ne.s32.totalorder %s5591_s8, %s5059_s14  ;;  %p5063_p6 = scmp.lt.u32.totalorder %s5059_s14, %s5591_s8 }
 0x548   :  { %p5065_p7 = pnand %p5063_p6, %p5060_p5 }
 0x54a   :  { %5068 = shalt.err (!%p5065_p7)
}
 0x54b   :  { %3798 = dma.vmem_to_hbm [thread:$0]  %s3796_s10, 128, %s5591_s8, [#allocation4]  }
 0x54c   :  { %5077 = dma.done.wait [#allocation4], 128  }
 0x54d   :  { %5078 = vsyncadd [#allocation4], 4294967168 }
 0x54e   :  { %3802 = vsyncpa [#allocation3], 1 }
 0x54f   :  { %3803 = vsyncpa [#allocation6], 1 }
 0x550   :  { %3804 = vsyncpa [#allocation9], 1 }
 0x551   :  { %3805 = vsyncpa [#allocation12], 1 }
 0x552   :  { %3806 = vsyncpa [#allocation4], 1 }

</bundles_post_ra>
